<compile_context>
chip_gen: v5e
topology: v5e:2x2
jax: 0.10.0
libtpu: 0.0.40
codegen_flags: <defaults>
</compile_context>

<pallas_src>
import jax
import jax.numpy as jnp
from jax.experimental import pallas as pl
from jax.experimental.pallas import tpu as pltpu

H1 = 64            # true fc1 width
H1_PAD = 128       # fc1 width padded to a full lane register
H2 = 256
H3 = 256
OUT_PAD = 128      # fc4 width padded to a full lane register

ROW_ALIGN = 16             # bf16 output block -> second-minor dim multiple of 16
DEFAULT_TILE_B = 2048      # amortizes ~0.35us/step grid overhead
VMEM_LIMIT_BYTES = 48 * 1024 * 1024   # > v5e 16MiB scoped default, < v7x 64MiB physical


def _round_up(x, m):
    return ((x + m - 1) // m) * m


def _mlp_kernel(x_ref,
                w1_ref, b1_ref,
                w2_ref, b2_ref,
                w3_ref, b3_ref,
                w4_ref, b4_ref,
                o_ref):
    # x: (tile_b, z_size) f32 or bf16.  Weights: bf16, (in, out).
    # Biases: f32, (1, out).  Output: bf16, (tile_b, OUT_PAD).
    x = x_ref[...].astype(jnp.bfloat16)

    h1 = jnp.dot(x, w1_ref[...], preferred_element_type=jnp.float32) + b1_ref[...]
    h1 = jnp.maximum(h1, 0.0).astype(jnp.bfloat16)

    h2 = jnp.dot(h1, w2_ref[...], preferred_element_type=jnp.float32) + b2_ref[...]
    h2 = jnp.maximum(h2, 0.0).astype(jnp.bfloat16)

    h3 = jnp.dot(h2, w3_ref[...], preferred_element_type=jnp.float32) + b3_ref[...]
    h3 = jnp.maximum(h3, 0.0).astype(jnp.bfloat16)

    h4 = jnp.dot(h3, w4_ref[...], preferred_element_type=jnp.float32) + b4_ref[...]
    o_ref[...] = jnp.tanh(h4).astype(o_ref.dtype)


def generator_mnist_in_code_forward(samples, kparams, code_dim,
                                    *, tile_b=DEFAULT_TILE_B):
    """samples: (B, z_size) f32 (or bf16).  kparams: output of prepare_params()."""
    B, z_size = samples.shape

    # --- batch tile selection -------------------------------------------------
    # Align to 16 rows (bf16 output block), never exceed the padded batch, and
    # guarantee >= 2 grid steps when possible so both v7x TensorCores get work
    # via the "parallel" batch axis (v5e/v6e: harmless).
    tile_b = _round_up(max(int(tile_b), ROW_ALIGN), ROW_ALIGN)
    tile_b = min(tile_b, _round_up(B, ROW_ALIGN))
    if B > ROW_ALIGN:
        tile_b = min(tile_b, _round_up(pl.cdiv(B, 2), ROW_ALIGN))
    tile_b = max(tile_b, ROW_ALIGN)

    B_pad = _round_up(B, tile_b)
    if B_pad != B:
        samples = jnp.pad(samples, ((0, B_pad - B), (0, 0)))

    grid = (B_pad // tile_b,)

    weight_args = (kparams["w1"], kparams["b1"],
                   kparams["w2"], kparams["b2"],
                   kparams["w3"], kparams["b3"],
                   kparams["w4"], kparams["b4"])

    in_specs = [pl.BlockSpec((tile_b, z_size), lambda i: (i, 0))]
    for a in weight_args:
        # Resident blocks: same block every grid step -> single-buffered.
        in_specs.append(pl.BlockSpec(a.shape, lambda i: (0, 0),
                                     pipeline_mode=pl.Buffered(1)))

    out_spec = pl.BlockSpec((tile_b, OUT_PAD), lambda i: (i, 0))

    flops = 2 * B_pad * (z_size * H1_PAD + H1_PAD * H2 + H2 * H3 + H3 * OUT_PAD)
    weight_bytes = sum(int(a.size) * a.dtype.itemsize for a in weight_args)
    bytes_accessed = (B_pad * z_size * samples.dtype.itemsize   # input stream
                      + B_pad * OUT_PAD * 2                     # bf16 output stream
                      + weight_bytes)
    cost = pl.CostEstimate(flops=flops,
                           transcendentals=B_pad * OUT_PAD,
                           bytes_accessed=bytes_accessed)

    out = pl.pallas_call(
        _mlp_kernel,
        out_shape=jax.ShapeDtypeStruct((B_pad, OUT_PAD), jnp.bfloat16),
        grid=grid,
        in_specs=in_specs,
        out_specs=out_spec,
        compiler_params=pltpu.CompilerParams(
            dimension_semantics=("parallel",),
            vmem_limit_bytes=VMEM_LIMIT_BYTES),
        cost_estimate=cost,
    )(samples, *weight_args)

    # Slice off padding / zero columns and restore the module's f32 output.
    return out[:B, :code_dim].astype(jnp.float32)


def init_params(key, z_size, code_dim):
    """Raw f32 params mimicking PyTorch nn.Linear default init:
    U(-1/sqrt(fan_in), 1/sqrt(fan_in)).  Weights stored as (in, out)."""
    dims = [(z_size, H1), (H1, H2), (H2, H3), (H3, code_dim)]
    params = {}
    for i, (fan_in, fan_out) in enumerate(dims, start=1):
        key, kw, kb = jax.random.split(key, 3)
        bound = 1.0 / float(fan_in) ** 0.5
        params[f"w{i}"] = jax.random.uniform(
            kw, (fan_in, fan_out), jnp.float32, minval=-bound, maxval=bound)
        params[f"b{i}"] = jax.random.uniform(
            kb, (1, fan_out), jnp.float32, minval=-bound, maxval=bound)
    return params


def prepare_params(raw):
    """One-time conversion to the kernel's device-resident layout:
    zero-pad fc1/fc4 to 128 lanes, cast weights to bf16, keep biases f32."""
    def pad_to(a, rows, cols):
        r, c = a.shape
        return jnp.pad(a, ((0, rows - r), (0, cols - c)))

    z_size = raw["w1"].shape[0]
    return {
        "w1": pad_to(raw["w1"], z_size, H1_PAD).astype(jnp.bfloat16),
        "b1": pad_to(raw["b1"], 1, H1_PAD),
        "w2": pad_to(raw["w2"], H1_PAD, H2).astype(jnp.bfloat16),
        "b2": raw["b2"],
        "w3": raw["w3"].astype(jnp.bfloat16),
        "b3": raw["b3"],
        "w4": pad_to(raw["w4"], H3, OUT_PAD).astype(jnp.bfloat16),
        "b4": pad_to(raw["b4"], 1, OUT_PAD),
    }


def _reference_forward_f32(samples, raw):
    x = jnp.maximum(samples @ raw["w1"] + raw["b1"], 0.0)
    x = jnp.maximum(x @ raw["w2"] + raw["b2"], 0.0)
    x = jnp.maximum(x @ raw["w3"] + raw["b3"], 0.0)
    return jnp.tanh(x @ raw["w4"] + raw["b4"])


def _reference_forward_bf16(samples, raw):
    """Reference with the same bf16-in / f32-accumulate dot scheme as the kernel."""
    def lin(x, w, b):
        return jnp.dot(x.astype(jnp.bfloat16), w.astype(jnp.bfloat16),
                       preferred_element_type=jnp.float32) + b
    x = jnp.maximum(lin(samples, raw["w1"], raw["b1"]), 0.0)
    x = jnp.maximum(lin(x, raw["w2"], raw["b2"]), 0.0)
    x = jnp.maximum(lin(x, raw["w3"], raw["b3"]), 0.0)
    return jnp.tanh(lin(x, raw["w4"], raw["b4"]))


if __name__ == "__main__":
    z_size = 32
    code_dim = 16
    batch = 300          # non-multiple of any tile -> exercises padding + >=2 grid steps

    key = jax.random.PRNGKey(0)
    key, kx = jax.random.split(key)
    samples = jax.random.normal(kx, (batch, z_size), jnp.float32)

    raw = init_params(key, z_size, code_dim)
    kparams = prepare_params(raw)   # do once; keep device-resident across steps

    # Default tile -> clamped so the batch grid has 2 steps (v7x megacore).
    out = generator_mnist_in_code_forward(samples, kparams, code_dim)
    out = jax.block_until_ready(out)
    assert out.shape == (batch, code_dim)

    # Small explicit tile -> exercises a 3-step grid as well.
    out_small_tile = generator_mnist_in_code_forward(
        samples, kparams, code_dim, tile_b=128)
    out_small_tile = jax.block_until_ready(out_small_tile)
    assert out_small_tile.shape == (batch, code_dim)
    assert jnp.allclose(out, out_small_tile, atol=1e-6, rtol=0.0)

    ref_bf16 = _reference_forward_bf16(samples, raw)
    ref_f32 = _reference_forward_f32(samples, raw)
    # bf16 output store adds up to ~4e-3 rounding on tanh values in (-1, 1).
    assert jnp.allclose(out, ref_bf16, atol=1e-2, rtol=0.0), \
        float(jnp.max(jnp.abs(out - ref_bf16)))
    assert jnp.allclose(out, ref_f32, atol=6e-2, rtol=0.0), \
        float(jnp.max(jnp.abs(out - ref_f32)))

    print("KERNEL_OK")
</pallas_src>

<mosaic_0001>
module attributes {stable_mosaic.version = 11 : i64} {
  func.func @_mlp_kernel(%arg0: i32, %arg1: memref<160x32xf32, #tpu.memory_space<vmem>>, %arg2: memref<32x128xbf16, #tpu.memory_space<vmem>>, %arg3: memref<1x128xf32, #tpu.memory_space<vmem>>, %arg4: memref<128x256xbf16, #tpu.memory_space<vmem>>, %arg5: memref<1x256xf32, #tpu.memory_space<vmem>>, %arg6: memref<256x256xbf16, #tpu.memory_space<vmem>>, %arg7: memref<1x256xf32, #tpu.memory_space<vmem>>, %arg8: memref<256x128xbf16, #tpu.memory_space<vmem>>, %arg9: memref<1x128xf32, #tpu.memory_space<vmem>>, %arg10: memref<160x128xbf16, #tpu.memory_space<vmem>>) attributes {dimension_semantics = [#tpu.dimension_semantics<parallel>], iteration_bounds = array<i64: 2>, scalar_prefetch = 0 : i64, scratch_operands = 0 : i64, tpu.core_type = #tpu.core_type<tc>, window_params = [{transform_indices = @transform_0, window_bounds = array<i64: 160, 32>}, {pipeline_mode = #tpu.pipeline_mode<synchronous>, transform_indices = @transform_1, window_bounds = array<i64: 32, 128>}, {pipeline_mode = #tpu.pipeline_mode<synchronous>, transform_indices = @transform_2, window_bounds = array<i64: 1, 128>}, {pipeline_mode = #tpu.pipeline_mode<synchronous>, transform_indices = @transform_3, window_bounds = array<i64: 128, 256>}, {pipeline_mode = #tpu.pipeline_mode<synchronous>, transform_indices = @transform_4, window_bounds = array<i64: 1, 256>}, {pipeline_mode = #tpu.pipeline_mode<synchronous>, transform_indices = @transform_5, window_bounds = array<i64: 256, 256>}, {pipeline_mode = #tpu.pipeline_mode<synchronous>, transform_indices = @transform_6, window_bounds = array<i64: 1, 256>}, {pipeline_mode = #tpu.pipeline_mode<synchronous>, transform_indices = @transform_7, window_bounds = array<i64: 256, 128>}, {pipeline_mode = #tpu.pipeline_mode<synchronous>, transform_indices = @transform_8, window_bounds = array<i64: 1, 128>}, {transform_indices = @transform_9, window_bounds = array<i64: 160, 128>}]} {
    %c0 = arith.constant 0 : index
    %c0_0 = arith.constant 0 : index
    %0 = vector.load %arg1[%c0, %c0_0] : memref<160x32xf32, #tpu.memory_space<vmem>>, vector<160x32xf32>
    %1 = arith.truncf %0 : vector<160x32xf32> to vector<160x32xbf16>
    %c0_1 = arith.constant 0 : index
    %c0_2 = arith.constant 0 : index
    %2 = vector.load %arg2[%c0_1, %c0_2] : memref<32x128xbf16, #tpu.memory_space<vmem>>, vector<32x128xbf16>
    %cst = arith.constant dense<0.000000e+00> : vector<160x128xf32>
    %3 = tpu.matmul %1, %2, %cst {dimension_numbers = #tpu.dot_dimension_numbers<[1], [0], [0], [1], [0, 0, 1, 1], [], []>} : vector<160x32xbf16>, vector<32x128xbf16>, vector<160x128xf32> -> vector<160x128xf32>
    %c0_3 = arith.constant 0 : index
    %c0_4 = arith.constant 0 : index
    %4 = vector.load %arg3[%c0_3, %c0_4] : memref<1x128xf32, #tpu.memory_space<vmem>>, vector<1x128xf32>
    %5 = vector.broadcast %4 : vector<1x128xf32> to vector<160x128xf32>
    %6 = arith.addf %3, %5 : vector<160x128xf32>
    %cst_5 = arith.constant 0.000000e+00 : f32
    %7 = vector.broadcast %cst_5 : f32 to vector<160x128xf32>
    %8 = arith.maximumf %6, %7 : vector<160x128xf32>
    %9 = arith.truncf %8 : vector<160x128xf32> to vector<160x128xbf16>
    %c0_6 = arith.constant 0 : index
    %c0_7 = arith.constant 0 : index
    %10 = vector.load %arg4[%c0_6, %c0_7] : memref<128x256xbf16, #tpu.memory_space<vmem>>, vector<128x256xbf16>
    %cst_8 = arith.constant dense<0.000000e+00> : vector<160x256xf32>
    %11 = tpu.matmul %9, %10, %cst_8 {dimension_numbers = #tpu.dot_dimension_numbers<[1], [0], [0], [1], [0, 0, 1, 1], [], []>} : vector<160x128xbf16>, vector<128x256xbf16>, vector<160x256xf32> -> vector<160x256xf32>
    %c0_9 = arith.constant 0 : index
    %c0_10 = arith.constant 0 : index
    %12 = vector.load %arg5[%c0_9, %c0_10] : memref<1x256xf32, #tpu.memory_space<vmem>>, vector<1x256xf32>
    %13 = vector.broadcast %12 : vector<1x256xf32> to vector<160x256xf32>
    %14 = arith.addf %11, %13 : vector<160x256xf32>
    %cst_11 = arith.constant 0.000000e+00 : f32
    %15 = vector.broadcast %cst_11 : f32 to vector<160x256xf32>
    %16 = arith.maximumf %14, %15 : vector<160x256xf32>
    %17 = arith.truncf %16 : vector<160x256xf32> to vector<160x256xbf16>
    %c0_12 = arith.constant 0 : index
    %c0_13 = arith.constant 0 : index
    %18 = vector.load %arg6[%c0_12, %c0_13] : memref<256x256xbf16, #tpu.memory_space<vmem>>, vector<256x256xbf16>
    %cst_14 = arith.constant dense<0.000000e+00> : vector<160x256xf32>
    %19 = tpu.matmul %17, %18, %cst_14 {dimension_numbers = #tpu.dot_dimension_numbers<[1], [0], [0], [1], [0, 0, 1, 1], [], []>} : vector<160x256xbf16>, vector<256x256xbf16>, vector<160x256xf32> -> vector<160x256xf32>
    %c0_15 = arith.constant 0 : index
    %c0_16 = arith.constant 0 : index
    %20 = vector.load %arg7[%c0_15, %c0_16] : memref<1x256xf32, #tpu.memory_space<vmem>>, vector<1x256xf32>
    %21 = vector.broadcast %20 : vector<1x256xf32> to vector<160x256xf32>
    %22 = arith.addf %19, %21 : vector<160x256xf32>
    %cst_17 = arith.constant 0.000000e+00 : f32
    %23 = vector.broadcast %cst_17 : f32 to vector<160x256xf32>
    %24 = arith.maximumf %22, %23 : vector<160x256xf32>
    %25 = arith.truncf %24 : vector<160x256xf32> to vector<160x256xbf16>
    %c0_18 = arith.constant 0 : index
    %c0_19 = arith.constant 0 : index
    %26 = vector.load %arg8[%c0_18, %c0_19] : memref<256x128xbf16, #tpu.memory_space<vmem>>, vector<256x128xbf16>
    %cst_20 = arith.constant dense<0.000000e+00> : vector<160x128xf32>
    %27 = tpu.matmul %25, %26, %cst_20 {dimension_numbers = #tpu.dot_dimension_numbers<[1], [0], [0], [1], [0, 0, 1, 1], [], []>} : vector<160x256xbf16>, vector<256x128xbf16>, vector<160x128xf32> -> vector<160x128xf32>
    %c0_21 = arith.constant 0 : index
    %c0_22 = arith.constant 0 : index
    %28 = vector.load %arg9[%c0_21, %c0_22] : memref<1x128xf32, #tpu.memory_space<vmem>>, vector<1x128xf32>
    %29 = vector.broadcast %28 : vector<1x128xf32> to vector<160x128xf32>
    %30 = arith.addf %27, %29 : vector<160x128xf32>
    %31 = math.tanh %30 : vector<160x128xf32>
    %32 = arith.truncf %31 : vector<160x128xf32> to vector<160x128xbf16>
    %c0_23 = arith.constant 0 : index
    %c0_24 = arith.constant 0 : index
    %33 = vector.load %arg10[%c0_23, %c0_24] : memref<160x128xbf16, #tpu.memory_space<vmem>>, vector<160x128xbf16>
    tpu.vector_store %arg10[%c0_23, %c0_24], %32 {strides = array<i32>} : memref<160x128xbf16, #tpu.memory_space<vmem>>, vector<160x128xbf16>,
    return
  }
  func.func @transform_0(%arg0: i32) -> (i32, i32) {
    %c0_i32 = arith.constant 0 : i32
    %c0_i32_0 = arith.constant 0 : i32
    return %arg0, %c0_i32 : i32, i32
  }
  func.func @transform_1(%arg0: i32) -> (i32, i32) {
    %c0_i32 = arith.constant 0 : i32
    %c0_i32_0 = arith.constant 0 : i32
    %c0_i32_1 = arith.constant 0 : i32
    return %c0_i32, %c0_i32_0 : i32, i32
  }
  func.func @transform_2(%arg0: i32) -> (i32, i32) {
    %c0_i32 = arith.constant 0 : i32
    %c0_i32_0 = arith.constant 0 : i32
    %c0_i32_1 = arith.constant 0 : i32
    return %c0_i32, %c0_i32_0 : i32, i32
  }
  func.func @transform_3(%arg0: i32) -> (i32, i32) {
    %c0_i32 = arith.constant 0 : i32
    %c0_i32_0 = arith.constant 0 : i32
    %c0_i32_1 = arith.constant 0 : i32
    return %c0_i32, %c0_i32_0 : i32, i32
  }
  func.func @transform_4(%arg0: i32) -> (i32, i32) {
    %c0_i32 = arith.constant 0 : i32
    %c0_i32_0 = arith.constant 0 : i32
    %c0_i32_1 = arith.constant 0 : i32
    return %c0_i32, %c0_i32_0 : i32, i32
  }
  func.func @transform_5(%arg0: i32) -> (i32, i32) {
    %c0_i32 = arith.constant 0 : i32
    %c0_i32_0 = arith.constant 0 : i32
    %c0_i32_1 = arith.constant 0 : i32
    return %c0_i32, %c0_i32_0 : i32, i32
  }
  func.func @transform_6(%arg0: i32) -> (i32, i32) {
    %c0_i32 = arith.constant 0 : i32
    %c0_i32_0 = arith.constant 0 : i32
    %c0_i32_1 = arith.constant 0 : i32
    return %c0_i32, %c0_i32_0 : i32, i32
  }
  func.func @transform_7(%arg0: i32) -> (i32, i32) {
    %c0_i32 = arith.constant 0 : i32
    %c0_i32_0 = arith.constant 0 : i32
    %c0_i32_1 = arith.constant 0 : i32
    return %c0_i32, %c0_i32_0 : i32, i32
  }
  func.func @transform_8(%arg0: i32) -> (i32, i32) {
    %c0_i32 = arith.constant 0 : i32
    %c0_i32_0 = arith.constant 0 : i32
    %c0_i32_1 = arith.constant 0 : i32
    return %c0_i32, %c0_i32_0 : i32, i32
  }
  func.func @transform_9(%arg0: i32) -> (i32, i32) {
    %c0_i32 = arith.constant 0 : i32
    %c0_i32_0 = arith.constant 0 : i32
    return %arg0, %c0_i32 : i32, i32
  }
}

</mosaic_0001>

<bundles_post_ra>
// kernel: tpu_custom_call.1
= control target key start
LH: loop header
LB: loop body
LE: loop exit
PB: predicated region body
PF: predicated region fallthrough
CT: control target
= control target key end

     0   :  { %14 = vsyncpa [#allocation3], 0  ;;  %s2943_s0 = inlined_call_operand.vmem [shape: f32[320,32], index: 0, kind: input, shape index: {}]   ;;  %s2944_s1 = inlined_call_operand.vmem [shape: bf16[32,128], index: 1, kind: input, shape index: {}]   ;;  %s2945_s2 = inlined_call_operand.vmem [shape: f32[1,128], index: 2, kind: input, shape index: {}]   ;;  %s2946_s3 = inlined_call_operand.vmem [shape: bf16[128,256], index: 3, kind: input, shape index: {}]   ;;  %s2947_s4 = inlined_call_operand.vmem [shape: f32[1,256], index: 4, kind: input, shape index: {}]   ;;  %s2948_s5 = inlined_call_operand.vmem [shape: bf16[256,256], index: 5, kind: input, shape index: {}]   ;;  %s2949_s6 = inlined_call_operand.vmem [shape: f32[1,256], index: 6, kind: input, shape index: {}]   ;;  %s2950_s7 = inlined_call_operand.hbm [shape: bf16[256,128], index: 7, kind: input, shape index: {}]   ;;  %s2951_s8 = inlined_call_operand.vmem [shape: f32[1,128], index: 8, kind: input, shape index: {}]   ;;  %s2952_s9 = inlined_call_operand.hbm [shape: bf16[320,128], index: 9, kind: output, shape index: {}]  }
   0x1   :  { %15 = vsyncpa [#allocation4], 0 }
   0x2   :  { %17 = vsyncpa [#allocation4 + $0x1], 0  ;;  %s2362_s30 = smov 0   ;;  %s2364_s10 = smov 0  }
   0x3   :  { %s2366_s11 = smov 0   ;;  %s2368_s12 = smov 0  }
   0x4 LB: > { %s2383_s13 = sadd.s32 4294967295, %s2305_s12   ;;  %s1696_s14 = sadd.s32 4294967294, %s2305_s12   ;;  %s2305_s12 = sphi %s2368_s12, %s2958_s12   ;;  %s2301_s11 = sphi %s2366_s11, %s2957_s11   ;;  %s2297_s10 = sphi %s2364_s10, %s2956_s10   ;;  %s2293_s30 = sphi %s2362_s30, %s2955_s30  }
   0x5   : > { %s2387_s15 = sadd.s32 1, %s2305_s12   ;;  %s224_s16 = sadd.s32 1, %s2301_s11 }
   0x6   : > { %s221_s17 = ssub.s32 %s2305_s12, %s2387_s15  ;;  %p234_p0 = scmp.ne.s32.totalorder %s2301_s11, %s2297_s10 }
   0x7   : > { %p222_p1 = scmp.eq.s32.totalorder %s221_s17, 0  ;;  %p235_p2 = scmp.eq.s32.totalorder %s2383_s13, 1 }
   0x8   : > { %p240_p3 = scmp.ne.s32.totalorder %s2297_s10, %s2293_s30  ;;  %p241_p4 = scmp.eq.s32.totalorder %s1696_s14, 1 }
   0x9   : > { %s2398_s18 = scalar_select %p222_p1, %s2301_s11, %s224_s16  }
   0xa   : > { %p2400_p5 = por %p235_p2, %p234_p0  ;;  %p2404_p6 = por %p241_p4, %p240_p3 }
   0xb   : > { %p1697_p7 = scmp.ge.s32.totalorder %s2305_s12, 1  ;;  %p248_p8 = scmp.lt.s32.totalorder %s2305_s12, 3 }
   0xc   : > { %p2127_p9 = scmp.eq.s32.totalorder %s2383_s13, 0  ;;  %s277_s23 = sshll.u32 %s2950_s7, 4  ;;  %s278_s23 = int_to_ptr.hbm [resolvable:$true] %s277_s23 }
   0xd   : > { %p249_p10 = pnand %p1697_p7, %p248_p8  ;;  %s2307_s24 = smov [#allocation2]  }
   0xe   : > { %s279_s25 = sshll.u32 %s2307_s24, 4  ;;  %s2308_s26 = smov 64   ;;  %s280_s25 = int_to_ptr.vmem [resolvable:$true] %s279_s25 }
   0xf   : > { %p2119_p11 = pneg %p249_p10  ;;  %s2309_s27 = smov 4  }
  0x10   : > { %307 = sbr.rel (%p249_p10) target bundleno = 773 (0x305), region = 56 }
  0x11   : > { %p2120_p12 = pnand %p2127_p9, %p2119_p11 }
  0x13   : > { %2122 = dma.hbm_to_vmem [thread:$0]  (!%p2120_p12), %s278_s23, 2048, %s280_s25, [#allocation3], %s2308_s26, %s2308_s26, %s2309_s27  }
  0x15   : > { %2284 = dma.done.wait (%p2127_p9), [#allocation3], 2048  }
  0x16   : > { %2286 = vsyncadd (%p2127_p9), [#allocation3], 4294965248  ;;  %s344_s28 = smul.u32 20, %s2383_s13  ;;  %v1981_v0 = vld [vmem:[%s2944_s1 + $0x8] sm:$0xff]  ;;  %v1980_v1 = vld [vmem:[%s2944_s1] sm:$0xff]  ;;  %vm402_vm0 = vcmask 261120  }
  0x17   : > { %439 = vmatpush.bf16.msra.mxu0 %v1981_v0  ;;  %2106 = vmatpush.bf16.msra.mxu1 %v1981_v0  ;;  %v1779_v11 = vld [vmem:[%s2946_s3 + $0x70] sm:$0xf]  ;;  %v1997_v12 = vld [vmem:[%s2946_s3 + $0x74] sm:$0xf0]  ;;  %v1996_v14 = vld [vmem:[%s2946_s3 + $0x74] sm:$0xf] }
  0x18   : > { %p345_p13 = scmp.lt.s32.totalorder %s344_s28, 39  ;;  %2107 = vmatpush.bf16.msra.mxu2 %v1981_v0  ;;  %2108 = vmatpush.bf16.msra.mxu3 %v1981_v0  ;;  %v1780_v13 = vor.u32 %v1997_v12, %v1779_v11  ;;  %v1781_v15 = vld [vmem:[%s2946_s3 + $0x78] sm:$0xf0]  ;;  %v1771_v17 = vld [vmem:[%s2946_s3 + $0x60] sm:$0xf] }
  0x19   : > { %v1784_v16 = vor.u32 %v1996_v14, %v1781_v15  ;;  %v1995_v18 = vld [vmem:[%s2946_s3 + $0x64] sm:$0xf0]  ;;  %v1994_v20 = vld [vmem:[%s2946_s3 + $0x64] sm:$0xf]  ;;  %v1773_v21 = vld [vmem:[%s2946_s3 + $0x68] sm:$0xf0] }
  0x1a   : > { %s2960_s28 = smov (!%p345_p13, %s344_s28), 39  ;;  %v1772_v19 = vor.u32 %v1995_v18, %v1771_v17  ;;  %v1776_v22 = vor.u32 %v1994_v20, %v1773_v21  ;;  %v1763_v23 = vld [vmem:[%s2946_s3 + $0x50] sm:$0xf]  ;;  %v1993_v24 = vld [vmem:[%s2946_s3 + $0x54] sm:$0xf0] }
  0x1b   : > { %s1702_s29 = sshll.u32 %s2960_s28, 3  ;;  %440 = vmatpush.bf16.msra.mxu0 %v1980_v1  ;;  %2109 = vmatpush.bf16.msra.mxu1 %v1980_v1  ;;  %v1992_v25 = vld [vmem:[%s2946_s3 + $0x54] sm:$0xf]  ;;  %v1765_v26 = vld [vmem:[%s2946_s3 + $0x58] sm:$0xf0]  ;;  %v1764_v31 = vor.u32 %v1993_v24, %v1763_v23  ;;  %s2046_s28 = smul.u32 80, %s2383_s13 }
  0x1c   : > { %s2427_s22 = scalar_lea.vmem %s2943_s0, %s1702_s29  ;;  %2110 = vmatpush.bf16.msra.mxu2 %v1980_v1  ;;  %2111 = vmatpush.bf16.msra.mxu3 %v1980_v1  ;;  %v1768_v35 = vor.u32 %v1992_v25, %v1765_v26  ;;  %v1755_v36 = vld [vmem:[%s2946_s3 + $0x40] sm:$0xf]  ;;  %v1991_v37 = vld [vmem:[%s2946_s3 + $0x44] sm:$0xf0]  ;;  %v1990_v38 = vld [vmem:[%s2946_s3 + $0x44] sm:$0xf] }
  0x1d   : > { %v352_v2 = vld [vmem:[%s2427_s22] sm:$0xff]  ;;  %v353_v3 = vld [vmem:[%s2427_s22 + $0x8] sm:$0xff]  ;;  %v362_v8 = vld [vmem:[%s2427_s22 + $0x50] sm:$0xff]  ;;  %v1756_v44 = vor.u32 %v1991_v37, %v1755_v36  ;;  %s1618_s16 = scalar_lea.hbm %s2952_s9, %s2046_s28  ;;  %s2259_s28 = scalar_lea.hbm %s2952_s9, 160 }
  0x1e   : > { %v356_v4 = vld [vmem:[%s2427_s22 + $0x20] sm:$0xff]  ;;  %v357_v5 = vld [vmem:[%s2427_s22 + $0x28] sm:$0xff]  ;;  %v372_v6 = vpack.c.bf16 %v353_v3, %v352_v2  ;;  %v363_v9 = vld [vmem:[%s2427_s22 + $0x58] sm:$0xff]  ;;  %s1621_s21 = sshll.u32 %s1618_s16, 4  ;;  %s1622_s21 = int_to_ptr.hbm [resolvable:$true] %s1621_s21 }
  0x1f   : > { %v374_v7 = vpack.c.bf16 %v357_v5, %v356_v4  ;;  %v377_v10 = vpack.c.bf16 %v363_v9, %v362_v8  ;;  %624 = vmatpush.bf16.msrb.mxu1 %v1780_v13  ;;  %v368_v27 = vld [vmem:[%s2427_s22 + $0x80] sm:$0xff]  ;;  %v369_v28 = vld [vmem:[%s2427_s22 + $0x88] sm:$0xff]  ;;  %v354_v29 = vld [vmem:[%s2427_s22 + $0x10] sm:$0xff]  ;;  %s2253_s13 = sshra.s32 %s1622_s21, 4  ;;  %s2254_s13 = int_to_ptr.hbm [resolvable:$true] %s2253_s13 }
  0x20   : > { %1711 = vmatmul.msk.bf16.vlgmr.msra.gmra.mxu0 %vm402_vm0, %v372_v6  ;;  %683 = vmatpush.bf16.msrb.mxu2 %v1784_v16  ;;  %v355_v30 = vld [vmem:[%s2427_s22 + $0x18] sm:$0xff]  ;;  %v380_v32 = vpack.c.bf16 %v369_v28, %v368_v27  ;;  %v358_v33 = vld [vmem:[%s2427_s22 + $0x30] sm:$0xff]  ;;  %v1757_v39 = vld [vmem:[%s2946_s3 + $0x48] sm:$0xf0]  ;;  %s2255_s24 = scalar_lea.hbm %s2254_s13, 80  ;;  %p2260_p3 = scmp.lt.s32.totalorder %s2254_s13, %s2952_s9 }
  0x21   : > { %1713 = vmatmul.msk.bf16.vlgmr.msra.gmra.mxu1 %vm402_vm0, %v374_v7  ;;  %1716 = vmatmul.msk.bf16.vlgmr.msra.gmra.mxu2 %vm402_vm0, %v377_v10  ;;  %v359_v34 = vld [vmem:[%s2427_s22 + $0x38] sm:$0xff]  ;;  %v373_v40 = vpack.c.bf16 %v355_v30, %v354_v29  ;;  %v364_v42 = vld [vmem:[%s2427_s22 + $0x60] sm:$0xff]  ;;  %v365_v43 = vld [vmem:[%s2427_s22 + $0x68] sm:$0xff]  ;;  %v1760_v45 = vor.u32 %v1990_v38, %v1757_v39  ;;  %p2256_p0 = scmp.ne.s32.totalorder %s2254_s13, %s2255_s24  ;;  %p2261_p4 = scmp.lt.s32.totalorder %s2259_s28, %s2255_s24 }
  0x22   : > { %1719 = vmatmul.msk.bf16.vlgmr.msra.gmra.mxu3 %vm402_vm0, %v380_v32  ;;  %v375_v41 = vpack.c.bf16 %v359_v34, %v358_v33  ;;  %v1747_v46 = vld [vmem:[%s2946_s3 + $0x30] sm:$0xf]  ;;  %v1989_v47 = vld [vmem:[%s2946_s3 + $0x34] sm:$0xf0]  ;;  %v1988_v48 = vld [vmem:[%s2946_s3 + $0x34] sm:$0xf]  ;;  %v378_v50 = vpack.c.bf16 %v365_v43, %v364_v42 }
  0x23   : > { %625 = vmatpush.bf16.msrb.mxu1 %v1772_v19  ;;  %v1749_v49 = vld [vmem:[%s2946_s3 + $0x38] sm:$0xf0]  ;;  %v1748_v51 = vor.u32 %v1989_v47, %v1747_v46  ;;  %v1739_v53 = vld [vmem:[%s2946_s3 + $0x20] sm:$0xf]  ;;  %v1987_v54 = vld [vmem:[%s2946_s3 + $0x24] sm:$0xf0]  ;;  %p2257_p1 = pnand %p2256_p0, %p2400_p5  ;;  %p2262_p7 = por %p2261_p4, %p2260_p3 }
  0x24   : > { %684 = vmatpush.bf16.msrb.mxu2 %v1776_v22  ;;  %v1752_v52 = vor.u32 %v1988_v48, %v1749_v49  ;;  %v1986_v55 = vld [vmem:[%s2946_s3 + $0x24] sm:$0xf]  ;;  %v1741_v56 = vld [vmem:[%s2946_s3 + $0x28] sm:$0xf0]  ;;  %v1740_v57 = vor.u32 %v1987_v54, %v1739_v53  ;;  %v366_v62 = vld [vmem:[%s2427_s22 + $0x70] sm:$0xff] }
  0x25   : > { %v1744_v58 = vor.u32 %v1986_v55, %v1741_v56  ;;  %v360_v59 = vld [vmem:[%s2427_s22 + $0x40] sm:$0xff]  ;;  %v361_v60 = vld [vmem:[%s2427_s22 + $0x48] sm:$0xff]  ;;  %v367_v63 = vld [vmem:[%s2427_s22 + $0x78] sm:$0xff]  ;;  %p2258_p2 = pneg %p2257_p1 }
  0x26   : > { %v376_v61 = vpack.c.bf16 %v361_v60, %v360_v59  ;;  %v379_v0 = vpack.c.bf16 %v367_v63, %v366_v62  ;;  %v370_v1 = vld [vmem:[%s2427_s22 + $0x90] sm:$0xff]  ;;  %v371_v2 = vld [vmem:[%s2427_s22 + $0x98] sm:$0xff]  ;;  %v1723_v10 = vld [vmem:[%s2946_s3] sm:$0xf]  ;;  %s341_s22 = sand.u32 1, %s2297_s10  }
  0x27   : > { %626 = vmatpush.bf16.msrb.mxu1 %v1764_v31  ;;  %v1731_v3 = vld [vmem:[%s2946_s3 + $0x10] sm:$0xf]  ;;  %v1985_v4 = vld [vmem:[%s2946_s3 + $0x14] sm:$0xf0]  ;;  %v381_v5 = vpack.c.bf16 %v371_v2, %v370_v1  ;;  %v1984_v6 = vld [vmem:[%s2946_s3 + $0x14] sm:$0xf]  ;;  %p2263_p8 = pnand %p2262_p7, %p2258_p2 }
  0x28   : > { %685 = vmatpush.bf16.msrb.mxu2 %v1768_v35  ;;  %v1732_v7 = vor.u32 %v1985_v4, %v1731_v3  ;;  %v1733_v8 = vld [vmem:[%s2946_s3 + $0x18] sm:$0xf0]  ;;  %v1983_v11 = vld [vmem:[%s2946_s3 + $0x4] sm:$0xf0]  ;;  %v1982_v12 = vld [vmem:[%s2946_s3 + $0x4] sm:$0xf] }
  0x29   : > { %v1736_v9 = vor.u32 %v1984_v6, %v1733_v8  ;;  %v1724_v13 = vor.u32 %v1983_v11, %v1723_v10  ;;  %v1725_v14 = vld [vmem:[%s2946_s3 + $0x8] sm:$0xf0]  ;;  %v2028_v16 = vld [vmem:[%s2948_s5 + $0xf4] sm:$0xf]  ;;  %v1909_v17 = vld [vmem:[%s2948_s5 + $0xf8] sm:$0xf0] }
  0x2a   : > { %v1728_v15 = vor.u32 %v1982_v12, %v1725_v14  ;;  %v2012_v18 = vld [vmem:[%s2948_s5 + $0x74] sm:$0xf]  ;;  %v1912_v19 = vor.u32 %v2028_v16, %v1909_v17  ;;  %v1845_v20 = vld [vmem:[%s2948_s5 + $0x78] sm:$0xf0]  ;;  %v2026_v22 = vld [vmem:[%s2948_s5 + $0xe4] sm:$0xf] }
  0x2b   : > { %627 = vmatpush.bf16.msrb.mxu1 %v1756_v44  ;;  %v1848_v21 = vor.u32 %v2012_v18, %v1845_v20  ;;  %v1901_v23 = vld [vmem:[%s2948_s5 + $0xe8] sm:$0xf0]  ;;  %v2010_v24 = vld [vmem:[%s2948_s5 + $0x64] sm:$0xf]  ;;  %v2585_v29 = vld [vmem:[%s2945_s2] ss:$0 sm:$0xff] }
  0x2c   : > { %686 = vmatpush.bf16.msrb.mxu2 %v1760_v45  ;;  %v1904_v26 = vor.u32 %v2026_v22, %v1901_v23  ;;  %v1837_v27 = vld [vmem:[%s2948_s5 + $0x68] sm:$0xf0]  ;;  %v2024_v36 = vld [vmem:[%s2948_s5 + $0xd4] sm:$0xf]  ;;  %v1893_v37 = vld [vmem:[%s2948_s5 + $0xd8] sm:$0xf0] }
  0x2d   : > { %v1840_v28 = vor.u32 %v2010_v24, %v1837_v27  ;;  %v2008_v38 = vld [vmem:[%s2948_s5 + $0x54] sm:$0xf]  ;;  %v1829_v42 = vld [vmem:[%s2948_s5 + $0x58] sm:$0xf0]  ;;  %v1821_v62 = vld [vmem:[%s2948_s5 + $0x48] sm:$0xf0] }
  0x2e   : > { %v1832_v43 = vor.u32 %v2008_v38, %v1829_v42  ;;  %v2020_v6 = vld [vmem:[%s2948_s5 + $0xb4] sm:$0xf]  ;;  %v1813_v11 = vld [vmem:[%s2948_s5 + $0x38] sm:$0xf0]  ;;  %v2018_v20 = vld [vmem:[%s2948_s5 + $0xa4] sm:$0xf] }
  0x2f   : > { %628 = vmatpush.bf16.msrb.mxu1 %v1748_v51  ;;  %v2022_v51 = vld [vmem:[%s2948_s5 + $0xc4] sm:$0xf]  ;;  %v2004_v8 = vld [vmem:[%s2948_s5 + $0x34] sm:$0xf]  ;;  %v1805_v24 = vld [vmem:[%s2948_s5 + $0x28] sm:$0xf0] }
  0x30   : > { %1712 = vmatmul.msk.bf16.gmra.mxu0 %vm402_vm0, %v373_v40  ;;  %687 = vmatpush.bf16.msrb.mxu2 %v1752_v52  ;;  %v1885_v52 = vld [vmem:[%s2948_s5 + $0xc8] sm:$0xf0]  ;;  %v1816_v12 = vor.u32 %v2004_v8, %v1813_v11  ;;  %v2002_v22 = vld [vmem:[%s2948_s5 + $0x24] sm:$0xf]  ;;  %v1827_v42 = vld [vmem:[%s2948_s5 + $0x50] sm:$0xf] }
  0x31   : > { %1714 = vmatmul.msk.bf16.gmra.mxu1 %vm402_vm0, %v375_v41  ;;  %1717 = vmatmul.msk.bf16.gmra.mxu2 %vm402_vm0, %v378_v50  ;;  %v1896_v41 = vor.u32 %v2024_v36, %v1893_v37  ;;  %v1888_v53 = vor.u32 %v2022_v51, %v1885_v52  ;;  %v1808_v27 = vor.u32 %v2002_v22, %v1805_v24  ;;  %v1835_v36 = vld [vmem:[%s2948_s5 + $0x60] sm:$0xf]  ;;  %v2011_v37 = vld [vmem:[%s2948_s5 + $0x64] sm:$0xf0]  ;;  %v1861_v52 = vld [vmem:[%s2948_s5 + $0x98] sm:$0xf0] }
  0x32   : > { %1720 = vmatmul.msk.bf16.gmra.mxu3 %vm402_vm0, %v381_v5  ;;  %s2112_s26 = smul.u32 80, %s341_s22  ;;  %s1607_s23 = scalar_lea.sflag [#allocation4], %s341_s22 }
  0x33   : > { %629 = vmatpush.bf16.msrb.mxu1 %v1740_v57 }
  0x34   : > { %688 = vmatpush.bf16.msrb.mxu2 %v1744_v58  ;;  %s2880_s27 = scalar_lea.vmem [#allocation5], %s2112_s26 }
  0x35   : > { %s1619_s17 = sshll.u32 %s2880_s27, 4  ;;  %s1620_s17 = int_to_ptr.vmem [resolvable:$true] %s1619_s17 }
  0x37   : > { %630 = vmatpush.bf16.msrb.mxu1 %v1732_v7  ;;  %v1877_v7 = vld [vmem:[%s2948_s5 + $0xb8] sm:$0xf0] }
  0x38   : > { %689 = vmatpush.bf16.msrb.mxu2 %v1736_v9  ;;  %v1880_v10 = vor.u32 %v2020_v6, %v1877_v7  ;;  %v1803_v6 = vld [vmem:[%s2948_s5 + $0x20] sm:$0xf]  ;;  %v2003_v7 = vld [vmem:[%s2948_s5 + $0x24] sm:$0xf0] }
  0x39   : > { %v1804_v8 = vor.u32 %v2003_v7, %v1803_v6 }
  0x3b   : > { %631 = vmatpush.bf16.msrb.mxu1 %v1724_v13 }
  0x3c   : > { %690 = vmatpush.bf16.msrb.mxu2 %v1728_v15 }
  0x3f   : > { %1118 = vmatpush.bf16.msra.mxu1 %v1848_v21  ;;  %v1869_v21 = vld [vmem:[%s2948_s5 + $0xa8] sm:$0xf0] }
  0x40   : > { %1177 = vmatpush.bf16.msra.mxu2 %v1912_v19  ;;  %v1872_v23 = vor.u32 %v2018_v20, %v1869_v21  ;;  %v2019_v20 = vld [vmem:[%s2948_s5 + $0xa4] sm:$0xf0] }
  0x41   : > { %1715 = vmatmul.msk.bf16.gmra.mxu1 %vm402_vm0, %v376_v61  ;;  %1718 = vmatmul.msk.bf16.gmra.mxu2 %vm402_vm0, %v379_v0  ;;  %v2006_v61 = vld [vmem:[%s2948_s5 + $0x44] sm:$0xf] }
  0x42   : > { %v1824_v63 = vor.u32 %v2006_v61, %v1821_v62 }
  0x43   : > { %1119 = vmatpush.bf16.msra.mxu1 %v1840_v28 }
  0x44   : > { %1178 = vmatpush.bf16.msra.mxu2 %v1904_v26  ;;  %v2013_v26 = vld [vmem:[%s2948_s5 + $0x74] sm:$0xf0] }
  0x47   : > { %1120 = vmatpush.bf16.msra.mxu1 %v1832_v43 }
  0x48   : > { %1179 = vmatpush.bf16.msra.mxu2 %v1896_v41  ;;  %v2029_v41 = vld [vmem:[%s2948_s5 + $0xf4] sm:$0xf0] }
  0x4b   : > { %1121 = vmatpush.bf16.msra.mxu1 %v1824_v63 }
  0x4c   : > { %1180 = vmatpush.bf16.msra.mxu2 %v1888_v53 }
  0x4f   : > { %1122 = vmatpush.bf16.msra.mxu1 %v1816_v12  ;;  %v1875_v12 = vld [vmem:[%s2948_s5 + $0xb0] sm:$0xf] }
  0x50   : > { %1181 = vmatpush.bf16.msra.mxu2 %v1880_v10  ;;  %v1797_v10 = vld [vmem:[%s2948_s5 + $0x18] sm:$0xf0] }
  0x53   : > { %1123 = vmatpush.bf16.msra.mxu1 %v1808_v27 }
  0x54   : > { %1182 = vmatpush.bf16.msra.mxu2 %v1872_v23 }
  0x9d   : > { %v442_v25 = vpop.f32.mrf.mxu0 }
  0x9e   : > { %v443_v30 = vadd.f32 %v2585_v29, %v442_v25  ;;  %v452_v40 = vpop.f32.mrf.mxu1  ;;  %v1843_v25 = vld [vmem:[%s2948_s5 + $0x70] sm:$0xf] }
  0x9f   : > { %v453_v55 = vadd.f32 %v2585_v29, %v452_v40  ;;  %v1844_v28 = vor.u32 %v2013_v26, %v1843_v25  ;;  %v1907_v40 = vld [vmem:[%s2948_s5 + $0xf0] sm:$0xf]  ;;  %v1787_v25 = vld [vmem:[%s2948_s5] sm:$0xf]  ;;  %v1999_v26 = vld [vmem:[%s2948_s5 + $0x4] sm:$0xf0] }
  0xa0   : > { %v492_v33 = vmax.f32 %v443_v30, 0.0  ;;  %v1908_v43 = vor.u32 %v2029_v41, %v1907_v40  ;;  %v1788_v27 = vor.u32 %v1999_v26, %v1787_v25  ;;  %v2014_v40 = vld [vmem:[%s2948_s5 + $0x84] sm:$0xf]  ;;  %v1853_v41 = vld [vmem:[%s2948_s5 + $0x88] sm:$0xf0] }
  0xa1   : > { %v496_v57 = vmax.f32 %v453_v55, 0.0  ;;  %1000 = vmatpush.bf16.msrb.mxu3 %v1844_v28  ;;  %v2025_v55 = vld [vmem:[%s2948_s5 + $0xd4] sm:$0xf0]  ;;  %v1859_v28 = vld [vmem:[%s2948_s5 + $0x90] sm:$0xf] }
  0xa2   : > { %1059 = vmatpush.bf16.msrb.mxu0 %v1908_v43  ;;  %v1998_v43 = vld [vmem:[%s2948_s5 + $0x4] sm:$0xf] }
  0xa4   : > { %v467_v9 = vpop.f32.mrf.mxu2 }
  0xa5   : > { %v444_v31 = vpop.f32.mrf.mxu0  ;;  %v482_v21 = vpop.f32.mrf.mxu3 }
  0xa6   : > { %v445_v32 = vadd.f32 %v2585_v29, %v444_v31  ;;  %v454_v47 = vpop.f32.mrf.mxu1  ;;  %v468_v31 = vadd.f32 %v2585_v29, %v467_v9  ;;  %v2000_v9 = vld [vmem:[%s2948_s5 + $0x14] sm:$0xf] }
  0xa7   : > { %v455_v56 = vadd.f32 %v2585_v29, %v454_v47  ;;  %v1800_v11 = vor.u32 %v2000_v9, %v1797_v10 }
  0xa8   : > { %v493_v34 = vmax.f32 %v445_v32, 0.0 }
  0xa9   : > { %v497_v58 = vmax.f32 %v455_v56, 0.0  ;;  %1124 = vmatpush.bf16.msra.mxu1 %v1800_v11 }
  0xaa   : > { %v512_v35 = vpack.c.bf16 %v493_v34, %v492_v33  ;;  %v502_v33 = vmax.f32 %v468_v31, 0.0 }
  0xab   : > { %v514_v59 = vpack.c.bf16 %v497_v58, %v496_v57 }
  0xac   : > { %632 = vmatmul.bf16.vlgmr.msrb.gmra.mxu1 %v512_v35  ;;  %691 = vmatmul.bf16.vlgmr.msrb.gmra.mxu2 %v512_v35  ;;  %v469_v18 = vpop.f32.mrf.mxu2 }
  0xad   : > { %v447_v39 = vpop.f32.mrf.mxu0  ;;  %v470_v32 = vadd.f32 %v2585_v29, %v469_v18 }
  0xae   : > { %v448_v44 = vadd.f32 %v2585_v29, %v447_v39  ;;  %v457_v54 = vpop.f32.mrf.mxu1  ;;  %v1836_v39 = vor.u32 %v2011_v37, %v1835_v36 }
  0xaf   : > { %v458_v0 = vadd.f32 %v2585_v29, %v457_v54  ;;  %v503_v34 = vmax.f32 %v470_v32, 0.0  ;;  %v1891_v54 = vld [vmem:[%s2948_s5 + $0xd0] sm:$0xf] }
  0xb0   : > { %v494_v48 = vmax.f32 %v448_v44, 0.0  ;;  %1001 = vmatpush.bf16.msrb.mxu3 %v1836_v39  ;;  %v2009_v44 = vld [vmem:[%s2948_s5 + $0x54] sm:$0xf0]  ;;  %v1892_v61 = vor.u32 %v2025_v55, %v1891_v54  ;;  %v484_v39 = vpop.f32.mrf.mxu3 }
  0xb1   : > { %v498_v3 = vmax.f32 %v458_v0, 0.0  ;;  %v517_v35 = vpack.c.bf16 %v503_v34, %v502_v33  ;;  %v1828_v47 = vor.u32 %v2009_v44, %v1827_v42  ;;  %v1851_v34 = vld [vmem:[%s2948_s5 + $0x80] sm:$0xf]  ;;  %v1856_v42 = vor.u32 %v2014_v40, %v1853_v41  ;;  %v1789_v44 = vld [vmem:[%s2948_s5 + $0x8] sm:$0xf0] }
  0xb4   : > { %v472_v30 = vpop.f32.mrf.mxu2  ;;  %1002 = vmatpush.bf16.msrb.mxu3 %v1828_v47  ;;  %v485_v47 = vadd.f32 %v2585_v29, %v484_v39 }
  0xb5   : > { %v449_v45 = vpop.f32.mrf.mxu0  ;;  %v473_v57 = vadd.f32 %v2585_v29, %v472_v30  ;;  %v2017_v30 = vld [vmem:[%s2948_s5 + $0x94] sm:$0xf0] }
  0xb6   : > { %v450_v46 = vadd.f32 %v2585_v29, %v449_v45  ;;  %v459_v60 = vpop.f32.mrf.mxu1  ;;  %v1899_v45 = vld [vmem:[%s2948_s5 + $0xe0] sm:$0xf]  ;;  %v1860_v31 = vor.u32 %v2017_v30, %v1859_v28  ;;  %v2043_v28 = vld [vmem:[#allocation2 + $0x68] sm:$0xff] }
  0xb7   : > { %v460_v1 = vadd.f32 %v2585_v29, %v459_v60  ;;  %v2005_v60 = vld [vmem:[%s2948_s5 + $0x34] sm:$0xf0]  ;;  %v504_v0 = vmax.f32 %v473_v57, 0.0 }
  0xb8   : > { %v495_v49 = vmax.f32 %v450_v46, 0.0  ;;  %v2027_v46 = vld [vmem:[%s2948_s5 + $0xe4] sm:$0xf0] }
  0xb9   : > { %v499_v4 = vmax.f32 %v460_v1, 0.0  ;;  %v1900_v51 = vor.u32 %v2027_v46, %v1899_v45  ;;  %v1792_v45 = vor.u32 %v1998_v43, %v1789_v44  ;;  %v483_v46 = vadd.f32 %v2585_v29, %v482_v21 }
  0xba   : > { %v513_v50 = vpack.c.bf16 %v495_v49, %v494_v48  ;;  %v1819_v48 = vld [vmem:[%s2948_s5 + $0x40] sm:$0xf]  ;;  %v2007_v49 = vld [vmem:[%s2948_s5 + $0x44] sm:$0xf0] }
  0xbb   : > { %v515_v5 = vpack.c.bf16 %v499_v4, %v498_v3  ;;  %v1820_v56 = vor.u32 %v2007_v49, %v1819_v48  ;;  %1060 = vmatpush.bf16.msrb.mxu0 %v1900_v51  ;;  %v2023_v3 = vld [vmem:[%s2948_s5 + $0xc4] sm:$0xf0]  ;;  %1125 = vmatpush.bf16.msra.mxu1 %v1792_v45  ;;  %v2045_v48 = vld [vmem:[#allocation2 + $0x78] sm:$0xff]  ;;  %v487_v49 = vpop.f32.mrf.mxu3  ;;  %v509_v51 = vmax.f32 %v485_v47, 0.0 }
  0xbc   : > { %637 = vmatmul.bf16.gmra.mxu1 %v513_v50  ;;  %696 = vmatmul.bf16.gmra.mxu2 %v513_v50  ;;  %v474_v38 = vpop.f32.mrf.mxu2  ;;  %v2016_v50 = vld [vmem:[%s2948_s5 + $0x94] sm:$0xf] }
  0xbd   : > { %v1864_v53 = vor.u32 %v2016_v50, %v1861_v52  ;;  %v475_v58 = vadd.f32 %v2585_v29, %v474_v38  ;;  %1003 = vmatpush.bf16.msrb.mxu3 %v1820_v56  ;;  %v2037_v38 = vld [vmem:[#allocation2 + $0x38] sm:$0xff]  ;;  %v508_v50 = vmax.f32 %v483_v46, 0.0  ;;  %v538_v52 = vld [vmem:[%s2947_s4] sm:$0x3]  ;;  %v2036_v56 = vld [vmem:[#allocation2 + $0x30] sm:$0xff] }
  0xbe   : > { %v462_v2 = vpop.f32.mrf.mxu1  ;;  %v2776_v55 = vperm.slane %v538_v52, 0  ;;  %v2042_v46 = vld [vmem:[#allocation2 + $0x60] sm:$0xff] }
  0xbf   : > { %v463_v14 = vadd.f32 %v2585_v29, %v462_v2  ;;  %1183 = vmatpush.bf16.msra.mxu2 %v1864_v53  ;;  %v505_v1 = vmax.f32 %v475_v58, 0.0  ;;  %1061 = vmatpush.bf16.msrb.mxu0 %v1892_v61  ;;  %v1883_v2 = vld [vmem:[%s2948_s5 + $0xc0] sm:$0xf]  ;;  %v520_v54 = vpack.c.bf16 %v509_v51, %v508_v50  ;;  %v488_v61 = vadd.f32 %v2585_v29, %v487_v49 }
  0xc0   : > { %v1884_v4 = vor.u32 %v2023_v3, %v1883_v2  ;;  %v2044_v3 = vld [vmem:[#allocation2 + $0x70] sm:$0xff] }
  0xc1   : > { %v500_v16 = vmax.f32 %v463_v14, 0.0 }
  0xc3   : > { %1062 = vmatpush.bf16.msrb.mxu0 %v1884_v4  ;;  %1184 = vmatpush.bf16.msra.mxu2 %v1856_v42  ;;  %v489_v57 = vpop.f32.mrf.mxu3  ;;  %v510_v4 = vmax.f32 %v488_v61, 0.0  ;;  %v2033_v61 = vld [vmem:[#allocation2 + $0x18] sm:$0xff] }
  0xc4   : > { %v477_v62 = vpop.f32.mrf.mxu2 }
  0xc5   : > { %v478_v23 = vadd.f32 %v2585_v29, %v477_v62  ;;  %v490_v62 = vadd.f32 %v2585_v29, %v489_v57 }
  0xc6   : > { %v464_v13 = vpop.f32.mrf.mxu1 }
  0xc7   : > { %v465_v15 = vadd.f32 %v2585_v29, %v464_v13  ;;  %v2021_v13 = vld [vmem:[%s2948_s5 + $0xb4] sm:$0xf0]  ;;  %v506_v32 = vmax.f32 %v478_v23, 0.0 }
  0xc8   : > { %v1876_v14 = vor.u32 %v2021_v13, %v1875_v12 }
  0xc9   : > { %v501_v17 = vmax.f32 %v465_v15, 0.0  ;;  %v1795_v15 = vld [vmem:[%s2948_s5 + $0x10] sm:$0xf] }
  0xca   : > { %1063 = vmatpush.bf16.msrb.mxu0 %v1876_v14 }
  0xcb   : > { %v516_v19 = vpack.c.bf16 %v501_v17, %v500_v16  ;;  %v2001_v16 = vld [vmem:[%s2948_s5 + $0x14] sm:$0xf0] }
  0xcc   : > { %642 = vmatmul.bf16.gmra.mxu1 %v514_v59  ;;  %701 = vmatmul.bf16.gmra.mxu2 %v514_v59  ;;  %v1811_v59 = vld [vmem:[%s2948_s5 + $0x30] sm:$0xf]  ;;  %v479_v17 = vpop.f32.mrf.mxu2  ;;  %v1796_v18 = vor.u32 %v2001_v16, %v1795_v15 }
  0xcd   : > { %v1812_v63 = vor.u32 %v2005_v60, %v1811_v59  ;;  %v480_v24 = vadd.f32 %v2585_v29, %v479_v17 }
  0xcf   : > { %1004 = vmatpush.bf16.msrb.mxu3 %v1812_v63  ;;  %v507_v33 = vmax.f32 %v480_v24, 0.0  ;;  %v2781_v63 = vperm.slane %v538_v52, 1 }
  0xd1   : > { %v519_v37 = vpack.c.bf16 %v507_v33, %v506_v32 }
  0xd3   : > { %1005 = vmatpush.bf16.msrb.mxu3 %v1804_v8 }
  0xd7   : > { %1006 = vmatpush.bf16.msrb.mxu3 %v1796_v18  ;;  %v2035_v18 = vld [vmem:[#allocation2 + $0x28] sm:$0xff] }
  0xdb   : > { %1007 = vmatpush.bf16.msrb.mxu3 %v1788_v27 }
  0xdc   : > { %647 = vmatmul.bf16.gmra.mxu1 %v515_v5  ;;  %706 = vmatmul.bf16.gmra.mxu2 %v515_v5  ;;  %v518_v5 = vpack.c.bf16 %v505_v1, %v504_v0 }
  0xdf   : > { %1428 = vmatpush.bf16.msra.mxu3 %v2037_v38 }
  0xe3   : > { %1429 = vmatpush.bf16.msra.mxu3 %v2036_v56 }
  0xe7   : > { %1430 = vmatpush.bf16.msra.mxu3 %v2035_v18 }
  0xec   : > { %652 = vmatmul.bf16.gmra.mxu1 %v516_v19  ;;  %711 = vmatmul.bf16.gmra.mxu2 %v516_v19  ;;  %v1867_v19 = vld [vmem:[%s2948_s5 + $0xa0] sm:$0xf] }
  0xed   : > { %v1868_v22 = vor.u32 %v2019_v20, %v1867_v19 }
  0xef   : > { %1064 = vmatpush.bf16.msrb.mxu0 %v1868_v22 }
  0xf3   : > { %1065 = vmatpush.bf16.msrb.mxu0 %v1860_v31 }
  0xfc   : > { %657 = vmatmul.bf16.gmra.mxu1 %v517_v35  ;;  %716 = vmatmul.bf16.gmra.mxu2 %v517_v35  ;;  %v2015_v35 = vld [vmem:[%s2948_s5 + $0x84] sm:$0xf0] }
  0xfd   : > { %v1852_v36 = vor.u32 %v2015_v35, %v1851_v34 }
  0xff   : > { %1066 = vmatpush.bf16.msrb.mxu0 %v1852_v36 }
 0x103   : > { %1487 = vmatpush.bf16.msra.mxu0 %v2045_v48 }
 0x107   : > { %1488 = vmatpush.bf16.msra.mxu0 %v2044_v3 }
 0x10b   : > { %1489 = vmatpush.bf16.msra.mxu0 %v2043_v28 }
 0x10c   : > { %662 = vmatmul.bf16.gmra.mxu1 %v518_v5  ;;  %721 = vmatmul.bf16.gmra.mxu2 %v518_v5  ;;  %v511_v5 = vmax.f32 %v490_v62, 0.0 }
 0x10e   : > { %v521_v12 = vpack.c.bf16 %v511_v5, %v510_v4  ;;  %v2041_v4 = vld [vmem:[#allocation2 + $0x58] sm:$0xff] }
 0x10f   : > { %1490 = vmatpush.bf16.msra.mxu0 %v2042_v46 }
 0x113   : > { %1491 = vmatpush.bf16.msra.mxu0 %v2041_v4 }
 0x11c   : > { %667 = vmatmul.bf16.gmra.mxu1 %v519_v37  ;;  %726 = vmatmul.bf16.gmra.mxu2 %v519_v37  ;;  %v2034_v37 = vld [vmem:[#allocation2 + $0x20] sm:$0xff] }
 0x11d   : > { %1431 = vmatpush.bf16.msra.mxu3 %v2034_v37 }
 0x121   : > { %1432 = vmatpush.bf16.msra.mxu3 %v2033_v61  ;;  %v2030_v61 = vld [vmem:[#allocation2] sm:$0xff] }
 0x129   : > { %v633_v53 = vpop.f32.mrf.mxu1 }
 0x12a   : > { %v634_v59 = vadd.f32 %v633_v53, %v2776_v55 }
 0x12c   : > { %672 = vmatmul.bf16.gmra.mxu1 %v520_v54  ;;  %731 = vmatmul.bf16.gmra.mxu2 %v520_v54  ;;  %v742_v1 = vmax.f32 %v634_v59, 0.0 }
 0x12f   : > { %v692_v58 = vpop.f32.mrf.mxu2 }
 0x130   : > { %v693_v6 = vadd.f32 %v692_v58, %v2781_v63 }
 0x131   : > { %v635_v60 = vpop.f32.mrf.mxu1 }
 0x132   : > { %v636_v0 = vadd.f32 %v635_v60, %v2776_v55  ;;  %v743_v11 = vmax.f32 %v693_v6, 0.0 }
 0x134   : > { %v744_v2 = vmax.f32 %v636_v0, 0.0 }
 0x136   : > { %v782_v7 = vpack.c.bf16 %v744_v2, %v742_v1 }
 0x137   : > { %v694_v8 = vpop.f32.mrf.mxu2 }
 0x138   : > { %v695_v9 = vadd.f32 %v694_v8, %v2781_v63  ;;  %1008 = vmatmul.bf16.vlgmr.msrb.gmra.mxu3 %v782_v7 }
 0x139   : > { %v638_v10 = vpop.f32.mrf.mxu1 }
 0x13a   : > { %v745_v29 = vmax.f32 %v695_v9, 0.0  ;;  %v639_v15 = vadd.f32 %v638_v10, %v2776_v55 }
 0x13c   : > { %677 = vmatmul.bf16.gmra.mxu1 %v521_v12  ;;  %736 = vmatmul.bf16.gmra.mxu2 %v521_v12  ;;  %v783_v13 = vpack.c.bf16 %v745_v29, %v743_v11  ;;  %v746_v19 = vmax.f32 %v639_v15, 0.0 }
 0x13e   : > { %1067 = vmatmul.bf16.vlgmr.msrb.gmra.mxu0 %v783_v13 }
 0x13f   : > { %v697_v14 = vpop.f32.mrf.mxu2 }
 0x140   : > { %v698_v21 = vadd.f32 %v697_v14, %v2781_v63  ;;  %v2032_v14 = vld [vmem:[#allocation2 + $0x10] sm:$0xff] }
 0x141   : > { %v640_v16 = vpop.f32.mrf.mxu1  ;;  %1433 = vmatpush.bf16.msra.mxu3 %v2032_v14 }
 0x142   : > { %v641_v17 = vadd.f32 %v640_v16, %v2776_v55  ;;  %v747_v26 = vmax.f32 %v698_v21, 0.0  ;;  %v2040_v21 = vld [vmem:[#allocation2 + $0x50] sm:$0xff] }
 0x143   : > { %1492 = vmatpush.bf16.msra.mxu0 %v2040_v21 }
 0x144   : > { %v748_v20 = vmax.f32 %v641_v17, 0.0 }
 0x146   : > { %v784_v22 = vpack.c.bf16 %v748_v20, %v746_v19 }
 0x147   : > { %v699_v23 = vpop.f32.mrf.mxu2 }
 0x148   : > { %v700_v24 = vadd.f32 %v699_v23, %v2781_v63  ;;  %1013 = vmatmul.bf16.gmra.mxu3 %v784_v22 }
 0x149   : > { %v643_v25 = vpop.f32.mrf.mxu1 }
 0x14a   : > { %v749_v27 = vmax.f32 %v700_v24, 0.0  ;;  %v644_v32 = vadd.f32 %v643_v25, %v2776_v55 }
 0x14c   : > { %1126 = vmatmul.bf16.vlgmr.msra.gmra.mxu1 %v782_v7  ;;  %1185 = vmatmul.bf16.vlgmr.msra.gmra.mxu2 %v783_v13  ;;  %v785_v30 = vpack.c.bf16 %v749_v27, %v747_v26  ;;  %v750_v35 = vmax.f32 %v644_v32, 0.0 }
 0x14e   : > { %1072 = vmatmul.bf16.gmra.mxu0 %v785_v30 }
 0x14f   : > { %v702_v31 = vpop.f32.mrf.mxu2 }
 0x150   : > { %v703_v38 = vadd.f32 %v702_v31, %v2781_v63 }
 0x151   : > { %v645_v33 = vpop.f32.mrf.mxu1 }
 0x152   : > { %v646_v34 = vadd.f32 %v645_v33, %v2776_v55  ;;  %v751_v43 = vmax.f32 %v703_v38, 0.0 }
 0x154   : > { %v752_v36 = vmax.f32 %v646_v34, 0.0 }
 0x156   : > { %v786_v39 = vpack.c.bf16 %v752_v36, %v750_v35  ;;  %v2031_v35 = vld [vmem:[#allocation2 + $0x8] sm:$0xff] }
 0x157   : > { %v704_v40 = vpop.f32.mrf.mxu2  ;;  %1434 = vmatpush.bf16.msra.mxu3 %v2031_v35 }
 0x158   : > { %v705_v41 = vadd.f32 %v704_v40, %v2781_v63  ;;  %1018 = vmatmul.bf16.gmra.mxu3 %v786_v39 }
 0x159   : > { %v648_v42 = vpop.f32.mrf.mxu1 }
 0x15a   : > { %v753_v44 = vmax.f32 %v705_v41, 0.0  ;;  %v649_v48 = vadd.f32 %v648_v42, %v2776_v55 }
 0x15b   : > { %1435 = vmatpush.bf16.msra.mxu3 %v2030_v61 }
 0x15c   : > { %1131 = vmatmul.bf16.gmra.mxu1 %v784_v22  ;;  %1190 = vmatmul.bf16.gmra.mxu2 %v785_v30  ;;  %v787_v45 = vpack.c.bf16 %v753_v44, %v751_v43  ;;  %v754_v51 = vmax.f32 %v649_v48, 0.0 }
 0x15e   : > { %1077 = vmatmul.bf16.gmra.mxu0 %v787_v45 }
 0x15f   : > { %v707_v47 = vpop.f32.mrf.mxu2 }
 0x160   : > { %v708_v53 = vadd.f32 %v707_v47, %v2781_v63 }
 0x161   : > { %v650_v49 = vpop.f32.mrf.mxu1 }
 0x162   : > { %v651_v50 = vadd.f32 %v650_v49, %v2776_v55  ;;  %v755_v59 = vmax.f32 %v708_v53, 0.0 }
 0x164   : > { %v756_v52 = vmax.f32 %v651_v50, 0.0 }
 0x166   : > { %v788_v54 = vpack.c.bf16 %v756_v52, %v754_v51 }
 0x167   : > { %v709_v56 = vpop.f32.mrf.mxu2 }
 0x168   : > { %v710_v57 = vadd.f32 %v709_v56, %v2781_v63  ;;  %1023 = vmatmul.bf16.gmra.mxu3 %v788_v54 }
 0x169   : > { %v653_v58 = vpop.f32.mrf.mxu1 }
 0x16a   : > { %v757_v60 = vmax.f32 %v710_v57, 0.0  ;;  %v654_v1 = vadd.f32 %v653_v58, %v2776_v55 }
 0x16c   : > { %1136 = vmatmul.bf16.gmra.mxu1 %v786_v39  ;;  %1195 = vmatmul.bf16.gmra.mxu2 %v787_v45  ;;  %v789_v62 = vpack.c.bf16 %v757_v60, %v755_v59  ;;  %v758_v5 = vmax.f32 %v654_v1, 0.0  ;;  %v2039_v45 = vld [vmem:[#allocation2 + $0x48] sm:$0xff] }
 0x16d   : > { %1493 = vmatpush.bf16.msra.mxu0 %v2039_v45 }
 0x16e   : > { %1082 = vmatmul.bf16.gmra.mxu0 %v789_v62 }
 0x16f   : > { %v712_v0 = vpop.f32.mrf.mxu2 }
 0x170   : > { %v713_v7 = vadd.f32 %v712_v0, %v2781_v63 }
 0x171   : > { %v655_v2 = vpop.f32.mrf.mxu1 }
 0x172   : > { %v656_v3 = vadd.f32 %v655_v2, %v2776_v55  ;;  %v759_v29 = vmax.f32 %v713_v7, 0.0  ;;  %v2038_v2 = vld [vmem:[#allocation2 + $0x40] sm:$0xff] }
 0x173   : > { %1494 = vmatpush.bf16.msra.mxu0 %v2038_v2 }
 0x174   : > { %v760_v6 = vmax.f32 %v656_v3, 0.0 }
 0x176   : > { %v790_v8 = vpack.c.bf16 %v760_v6, %v758_v5 }
 0x177   : > { %v714_v9 = vpop.f32.mrf.mxu2 }
 0x178   : > { %v715_v10 = vadd.f32 %v714_v9, %v2781_v63  ;;  %1028 = vmatmul.bf16.gmra.mxu3 %v790_v8 }
 0x179   : > { %v658_v11 = vpop.f32.mrf.mxu1 }
 0x17a   : > { %v761_v12 = vmax.f32 %v715_v10, 0.0  ;;  %v659_v16 = vadd.f32 %v658_v11, %v2776_v55 }
 0x17c   : > { %1141 = vmatmul.bf16.gmra.mxu1 %v788_v54  ;;  %1200 = vmatmul.bf16.gmra.mxu2 %v789_v62  ;;  %v791_v13 = vpack.c.bf16 %v761_v12, %v759_v29  ;;  %v762_v19 = vmax.f32 %v659_v16, 0.0 }
 0x17e   : > { %1087 = vmatmul.bf16.gmra.mxu0 %v791_v13 }
 0x17f   : > { %v717_v15 = vpop.f32.mrf.mxu2 }
 0x180   : > { %v718_v22 = vadd.f32 %v717_v15, %v2781_v63 }
 0x181   : > { %v660_v17 = vpop.f32.mrf.mxu1 }
 0x182   : > { %v661_v18 = vadd.f32 %v660_v17, %v2776_v55  ;;  %v763_v27 = vmax.f32 %v718_v22, 0.0 }
 0x184   : > { %v764_v20 = vmax.f32 %v661_v18, 0.0 }
 0x186   : > { %v792_v23 = vpack.c.bf16 %v764_v20, %v762_v19 }
 0x187   : > { %v719_v24 = vpop.f32.mrf.mxu2 }
 0x188   : > { %v720_v25 = vadd.f32 %v719_v24, %v2781_v63  ;;  %1033 = vmatmul.bf16.gmra.mxu3 %v792_v23  ;;  %v834_v24 = vld [vmem:[%s2949_s6] sm:$0x3] }
 0x189   : > { %v663_v26 = vpop.f32.mrf.mxu1 }
 0x18a   : > { %v765_v28 = vmax.f32 %v720_v25, 0.0  ;;  %v664_v32 = vadd.f32 %v663_v26, %v2776_v55 }
 0x18c   : > { %1146 = vmatmul.bf16.gmra.mxu1 %v790_v8  ;;  %1205 = vmatmul.bf16.gmra.mxu2 %v791_v13  ;;  %v793_v30 = vpack.c.bf16 %v765_v28, %v763_v27  ;;  %v766_v36 = vmax.f32 %v664_v32, 0.0  ;;  %v2824_v28 = vperm.slane %v834_v24, 0 }
 0x18e   : > { %1092 = vmatmul.bf16.gmra.mxu0 %v793_v30 }
 0x18f   : > { %v722_v31 = vpop.f32.mrf.mxu2 }
 0x190   : > { %v723_v38 = vadd.f32 %v722_v31, %v2781_v63 }
 0x191   : > { %v665_v33 = vpop.f32.mrf.mxu1 }
 0x192   : > { %v666_v34 = vadd.f32 %v665_v33, %v2776_v55  ;;  %v767_v43 = vmax.f32 %v723_v38, 0.0 }
 0x194   : > { %v768_v37 = vmax.f32 %v666_v34, 0.0 }
 0x196   : > { %v794_v39 = vpack.c.bf16 %v768_v37, %v766_v36 }
 0x197   : > { %v724_v40 = vpop.f32.mrf.mxu2 }
 0x198   : > { %v725_v41 = vadd.f32 %v724_v40, %v2781_v63  ;;  %1038 = vmatmul.bf16.gmra.mxu3 %v794_v39 }
 0x199   : > { %v668_v42 = vpop.f32.mrf.mxu1 }
 0x19a   : > { %v769_v44 = vmax.f32 %v725_v41, 0.0  ;;  %v669_v48 = vadd.f32 %v668_v42, %v2776_v55  ;;  %v2829_v41 = vperm.slane %v834_v24, 1 }
 0x19c   : > { %1151 = vmatmul.bf16.gmra.mxu1 %v792_v23  ;;  %1210 = vmatmul.bf16.gmra.mxu2 %v793_v30  ;;  %v795_v46 = vpack.c.bf16 %v769_v44, %v767_v43  ;;  %v770_v51 = vmax.f32 %v669_v48, 0.0 }
 0x19e   : > { %1097 = vmatmul.bf16.gmra.mxu0 %v795_v46 }
 0x19f   : > { %v727_v47 = vpop.f32.mrf.mxu2 }
 0x1a0   : > { %v728_v53 = vadd.f32 %v727_v47, %v2781_v63 }
 0x1a1   : > { %v670_v49 = vpop.f32.mrf.mxu1 }
 0x1a2   : > { %v671_v50 = vadd.f32 %v670_v49, %v2776_v55  ;;  %v771_v59 = vmax.f32 %v728_v53, 0.0 }
 0x1a4   : > { %v772_v52 = vmax.f32 %v671_v50, 0.0 }
 0x1a6   : > { %v796_v54 = vpack.c.bf16 %v772_v52, %v770_v51 }
 0x1a7   : > { %v729_v56 = vpop.f32.mrf.mxu2 }
 0x1a8   : > { %v730_v57 = vadd.f32 %v729_v56, %v2781_v63  ;;  %1043 = vmatmul.bf16.gmra.mxu3 %v796_v54 }
 0x1a9   : > { %v673_v58 = vpop.f32.mrf.mxu1 }
 0x1aa   : > { %v773_v60 = vmax.f32 %v730_v57, 0.0  ;;  %v674_v1 = vadd.f32 %v673_v58, %v2776_v55 }
 0x1ac   : > { %1156 = vmatmul.bf16.gmra.mxu1 %v794_v39  ;;  %1215 = vmatmul.bf16.gmra.mxu2 %v795_v46  ;;  %v797_v62 = vpack.c.bf16 %v773_v60, %v771_v59  ;;  %v774_v5 = vmax.f32 %v674_v1, 0.0 }
 0x1ae   : > { %1102 = vmatmul.bf16.gmra.mxu0 %v797_v62 }
 0x1af   : > { %v732_v0 = vpop.f32.mrf.mxu2 }
 0x1b0   : > { %v733_v7 = vadd.f32 %v732_v0, %v2781_v63 }
 0x1b1   : > { %v675_v3 = vpop.f32.mrf.mxu1 }
 0x1b2   : > { %v676_v4 = vadd.f32 %v675_v3, %v2776_v55  ;;  %v775_v29 = vmax.f32 %v733_v7, 0.0 }
 0x1b4   : > { %v776_v6 = vmax.f32 %v676_v4, 0.0 }
 0x1b6   : > { %v798_v8 = vpack.c.bf16 %v776_v6, %v774_v5 }
 0x1b7   : > { %v734_v9 = vpop.f32.mrf.mxu2 }
 0x1b8   : > { %v735_v10 = vadd.f32 %v734_v9, %v2781_v63  ;;  %1048 = vmatmul.bf16.gmra.mxu3 %v798_v8 }
 0x1b9   : > { %v678_v11 = vpop.f32.mrf.mxu1 }
 0x1ba   : > { %v777_v12 = vmax.f32 %v735_v10, 0.0  ;;  %v679_v17 = vadd.f32 %v678_v11, %v2776_v55 }
 0x1bb   : > { %v1009_v13 = vpop.f32.mrf.mxu3  ;;  %v1068_v14 = vpop.f32.mrf.mxu0 }
 0x1bc   : > { %1161 = vmatmul.bf16.gmra.mxu1 %v796_v54  ;;  %1220 = vmatmul.bf16.gmra.mxu2 %v797_v62  ;;  %v799_v15 = vpack.c.bf16 %v777_v12, %v775_v29  ;;  %v778_v22 = vmax.f32 %v679_v17, 0.0  ;;  %v1010_v36 = vadd.f32 %v1009_v13, %v2824_v28 }
 0x1be   : > { %1107 = vmatmul.bf16.gmra.mxu0 %v799_v15  ;;  %v1069_v40 = vadd.f32 %v1068_v14, %v1010_v36 }
 0x1bf   : > { %v737_v16 = vpop.f32.mrf.mxu2 }
 0x1c0   : > { %v738_v25 = vadd.f32 %v737_v16, %v2781_v63  ;;  %v1236_v45 = vmax.f32 %v1069_v40, 0.0 }
 0x1c1   : > { %v680_v18 = vpop.f32.mrf.mxu1 }
 0x1c2   : > { %v681_v19 = vadd.f32 %v680_v18, %v2776_v55  ;;  %v779_v32 = vmax.f32 %v738_v25, 0.0 }
 0x1c3   : > { %v1011_v20 = vpop.f32.mrf.mxu3  ;;  %v1070_v21 = vpop.f32.mrf.mxu0 }
 0x1c4   : > { %v780_v23 = vmax.f32 %v681_v19, 0.0  ;;  %v1012_v55 = vadd.f32 %v1011_v20, %v2824_v28 }
 0x1c6   : > { %v800_v26 = vpack.c.bf16 %v780_v23, %v778_v22  ;;  %v1071_v38 = vadd.f32 %v1070_v21, %v1012_v55 }
 0x1c7   : > { %v739_v27 = vpop.f32.mrf.mxu2 }
 0x1c8   : > { %v740_v30 = vadd.f32 %v739_v27, %v2781_v63  ;;  %1053 = vmatmul.bf16.gmra.mxu3 %v800_v26  ;;  %v1238_v42 = vmax.f32 %v1071_v38, 0.0 }
 0x1c9   : > { %v1127_v31 = vpop.f32.mrf.mxu1 }
 0x1ca   : > { %v781_v33 = vmax.f32 %v740_v30, 0.0  ;;  %v1128_v46 = vadd.f32 %v1127_v31, %v2829_v41  ;;  %v1276_v47 = vpack.c.bf16 %v1238_v42, %v1236_v45 }
 0x1cb   : > { %v1014_v34 = vpop.f32.mrf.mxu3  ;;  %v1073_v35 = vpop.f32.mrf.mxu0 }
 0x1cc   : > { %1166 = vmatmul.bf16.gmra.mxu1 %v798_v8  ;;  %1225 = vmatmul.bf16.gmra.mxu2 %v799_v15  ;;  %v801_v37 = vpack.c.bf16 %v781_v33, %v779_v32  ;;  %v1015_v59 = vadd.f32 %v1014_v34, %v2824_v28 }
 0x1ce   : > { %1112 = vmatmul.bf16.gmra.mxu0 %v801_v37  ;;  %v1074_v0 = vadd.f32 %v1073_v35, %v1015_v59 }
 0x1cf   : > { %v1186_v39 = vpop.f32.mrf.mxu2 }
 0x1d0   : > { %v1187_v48 = vadd.f32 %v1186_v39, %v1128_v46  ;;  %v1240_v5 = vmax.f32 %v1074_v0, 0.0 }
 0x1d1   : > { %v1129_v63 = vpop.f32.mrf.mxu1 }
 0x1d2   : > { %v1130_v49 = vadd.f32 %v1129_v63, %v2829_v41  ;;  %v1237_v53 = vmax.f32 %v1187_v48, 0.0 }
 0x1d3   : > { %v1016_v43 = vpop.f32.mrf.mxu3  ;;  %v1075_v44 = vpop.f32.mrf.mxu0 }
 0x1d4   : > { %v1017_v54 = vadd.f32 %v1016_v43, %v2824_v28 }
 0x1d6   : > { %v1076_v61 = vadd.f32 %v1075_v44, %v1017_v54 }
 0x1d7   : > { %v1188_v50 = vpop.f32.mrf.mxu2 }
 0x1d8   : > { %v1189_v51 = vadd.f32 %v1188_v50, %v1130_v49  ;;  %1436 = vmatmul.bf16.vlgmr.msra.gmra.mxu3 %v1276_v47  ;;  %v1242_v2 = vmax.f32 %v1076_v61, 0.0 }
 0x1d9   : > { %v1132_v52 = vpop.f32.mrf.mxu1 }
 0x1da   : > { %v1239_v56 = vmax.f32 %v1189_v51, 0.0  ;;  %v1133_v6 = vadd.f32 %v1132_v52, %v2829_v41  ;;  %v1278_v9 = vpack.c.bf16 %v1242_v2, %v1240_v5 }
 0x1db   : > { %v1019_v57 = vpop.f32.mrf.mxu3  ;;  %v1078_v58 = vpop.f32.mrf.mxu0 }
 0x1dc   : > { %v1277_v60 = vpack.c.bf16 %v1239_v56, %v1237_v53  ;;  %1171 = vmatmul.bf16.gmra.mxu1 %v800_v26  ;;  %1230 = vmatmul.bf16.gmra.mxu2 %v801_v37  ;;  %v1020_v17 = vadd.f32 %v1019_v57, %v2824_v28 }
 0x1de   : > { %1495 = vmatmul.bf16.vlgmr.msra.gmra.mxu0 %v1277_v60  ;;  %v1079_v21 = vadd.f32 %v1078_v58, %v1020_v17 }
 0x1df   : > { %v1191_v62 = vpop.f32.mrf.mxu2 }
 0x1e0   : > { %v1192_v7 = vadd.f32 %v1191_v62, %v1133_v6  ;;  %v1244_v26 = vmax.f32 %v1079_v21, 0.0 }
 0x1e1   : > { %v1134_v1 = vpop.f32.mrf.mxu1 }
 0x1e2   : > { %v1135_v8 = vadd.f32 %v1134_v1, %v2829_v41  ;;  %v1241_v12 = vmax.f32 %v1192_v7, 0.0 }
 0x1e3   : > { %v1021_v3 = vpop.f32.mrf.mxu3  ;;  %v1080_v4 = vpop.f32.mrf.mxu0 }
 0x1e4   : > { %v1022_v13 = vadd.f32 %v1021_v3, %v2824_v28 }
 0x1e6   : > { %v1081_v19 = vadd.f32 %v1080_v4, %v1022_v13 }
 0x1e7   : > { %v1193_v10 = vpop.f32.mrf.mxu2 }
 0x1e8   : > { %v1194_v11 = vadd.f32 %v1193_v10, %v1135_v8  ;;  %1441 = vmatmul.bf16.gmra.mxu3 %v1278_v9  ;;  %v1246_v23 = vmax.f32 %v1081_v19, 0.0 }
 0x1e9   : > { %v1137_v29 = vpop.f32.mrf.mxu1 }
 0x1ea   : > { %v1243_v14 = vmax.f32 %v1194_v11, 0.0  ;;  %v1138_v27 = vadd.f32 %v1137_v29, %v2829_v41  ;;  %v1280_v32 = vpack.c.bf16 %v1246_v23, %v1244_v26 }
 0x1eb   : > { %v1024_v15 = vpop.f32.mrf.mxu3  ;;  %v1083_v16 = vpop.f32.mrf.mxu0 }
 0x1ec   : > { %v1279_v18 = vpack.c.bf16 %v1243_v14, %v1241_v12  ;;  %v1025_v40 = vadd.f32 %v1024_v15, %v2824_v28 }
 0x1ee   : > { %1500 = vmatmul.bf16.gmra.mxu0 %v1279_v18  ;;  %v1084_v44 = vadd.f32 %v1083_v16, %v1025_v40 }
 0x1ef   : > { %v1196_v20 = vpop.f32.mrf.mxu2 }
 0x1f0   : > { %v1197_v30 = vadd.f32 %v1196_v20, %v1138_v27  ;;  %v1248_v49 = vmax.f32 %v1084_v44, 0.0 }
 0x1f1   : > { %v1139_v22 = vpop.f32.mrf.mxu1 }
 0x1f2   : > { %v1140_v31 = vadd.f32 %v1139_v22, %v2829_v41  ;;  %v1245_v35 = vmax.f32 %v1197_v30, 0.0 }
 0x1f3   : > { %v1026_v24 = vpop.f32.mrf.mxu3  ;;  %v1085_v25 = vpop.f32.mrf.mxu0 }
 0x1f4   : > { %v1027_v36 = vadd.f32 %v1026_v24, %v2824_v28 }
 0x1f6   : > { %v1086_v42 = vadd.f32 %v1085_v25, %v1027_v36 }
 0x1f7   : > { %v1198_v55 = vpop.f32.mrf.mxu2 }
 0x1f8   : > { %v1199_v33 = vadd.f32 %v1198_v55, %v1140_v31  ;;  %1446 = vmatmul.bf16.gmra.mxu3 %v1280_v32  ;;  %v1250_v46 = vmax.f32 %v1086_v42, 0.0 }
 0x1f9   : > { %v1142_v34 = vpop.f32.mrf.mxu1 }
 0x1fa   : > { %v1247_v37 = vmax.f32 %v1199_v33, 0.0  ;;  %v1143_v50 = vadd.f32 %v1142_v34, %v2829_v41  ;;  %v1282_v53 = vpack.c.bf16 %v1250_v46, %v1248_v49 }
 0x1fb   : > { %v1029_v38 = vpop.f32.mrf.mxu3  ;;  %v1088_v39 = vpop.f32.mrf.mxu0 }
 0x1fc   : > { %v1281_v63 = vpack.c.bf16 %v1247_v37, %v1245_v35  ;;  %v1030_v0 = vadd.f32 %v1029_v38, %v2824_v28 }
 0x1fe   : > { %1505 = vmatmul.bf16.gmra.mxu0 %v1281_v63  ;;  %v1089_v4 = vadd.f32 %v1088_v39, %v1030_v0 }
 0x1ff   : > { %v1201_v43 = vpop.f32.mrf.mxu2 }
 0x200   : > { %v1202_v51 = vadd.f32 %v1201_v43, %v1143_v50  ;;  %v1252_v9 = vmax.f32 %v1089_v4, 0.0 }
 0x201   : > { %v1144_v45 = vpop.f32.mrf.mxu1 }
 0x202   : > { %v1145_v52 = vadd.f32 %v1144_v45, %v2829_v41  ;;  %v1249_v58 = vmax.f32 %v1202_v51, 0.0 }
 0x203   : > { %v1031_v47 = vpop.f32.mrf.mxu3  ;;  %v1090_v48 = vpop.f32.mrf.mxu0 }
 0x204   : > { %v1032_v59 = vadd.f32 %v1031_v47, %v2824_v28 }
 0x206   : > { %v1091_v2 = vadd.f32 %v1090_v48, %v1032_v59 }
 0x207   : > { %v1203_v54 = vpop.f32.mrf.mxu2 }
 0x208   : > { %v1204_v56 = vadd.f32 %v1203_v54, %v1145_v52  ;;  %1451 = vmatmul.bf16.gmra.mxu3 %v1282_v53  ;;  %v1254_v6 = vmax.f32 %v1091_v2, 0.0 }
 0x209   : > { %v1147_v57 = vpop.f32.mrf.mxu1 }
 0x20a   : > { %v1251_v60 = vmax.f32 %v1204_v56, 0.0  ;;  %v1148_v10 = vadd.f32 %v1147_v57, %v2829_v41  ;;  %v1284_v12 = vpack.c.bf16 %v1254_v6, %v1252_v9 }
 0x20b   : > { %v1034_v61 = vpop.f32.mrf.mxu3  ;;  %v1093_v62 = vpop.f32.mrf.mxu0 }
 0x20c   : > { %v1283_v1 = vpack.c.bf16 %v1251_v60, %v1249_v58  ;;  %v1035_v21 = vadd.f32 %v1034_v61, %v2824_v28 }
 0x20e   : > { %1510 = vmatmul.bf16.gmra.mxu0 %v1283_v1  ;;  %v1094_v25 = vadd.f32 %v1093_v62, %v1035_v21 }
 0x20f   : > { %v1206_v3 = vpop.f32.mrf.mxu2 }
 0x210   : > { %v1207_v11 = vadd.f32 %v1206_v3, %v1148_v10  ;;  %v1256_v32 = vmax.f32 %v1094_v25, 0.0 }
 0x211   : > { %v1149_v5 = vpop.f32.mrf.mxu1 }
 0x212   : > { %v1150_v29 = vadd.f32 %v1149_v5, %v2829_v41  ;;  %v1253_v16 = vmax.f32 %v1207_v11, 0.0 }
 0x213   : > { %v1036_v7 = vpop.f32.mrf.mxu3  ;;  %v1095_v8 = vpop.f32.mrf.mxu0 }
 0x214   : > { %v1037_v17 = vadd.f32 %v1036_v7, %v2824_v28 }
 0x216   : > { %v1096_v23 = vadd.f32 %v1095_v8, %v1037_v17 }
 0x217   : > { %v1208_v13 = vpop.f32.mrf.mxu2 }
 0x218   : > { %v1209_v14 = vadd.f32 %v1208_v13, %v1150_v29  ;;  %1456 = vmatmul.bf16.gmra.mxu3 %v1284_v12  ;;  %v1258_v27 = vmax.f32 %v1096_v23, 0.0 }
 0x219   : > { %v1152_v15 = vpop.f32.mrf.mxu1 }
 0x21a   : > { %v1255_v18 = vmax.f32 %v1209_v14, 0.0  ;;  %v1153_v55 = vadd.f32 %v1152_v15, %v2829_v41  ;;  %v1286_v35 = vpack.c.bf16 %v1258_v27, %v1256_v32 }
 0x21b   : > { %v1039_v19 = vpop.f32.mrf.mxu3  ;;  %v1098_v20 = vpop.f32.mrf.mxu0 }
 0x21c   : > { %v1285_v22 = vpack.c.bf16 %v1255_v18, %v1253_v16  ;;  %v1040_v44 = vadd.f32 %v1039_v19, %v2824_v28 }
 0x21e   : > { %1515 = vmatmul.bf16.gmra.mxu0 %v1285_v22  ;;  %v1099_v48 = vadd.f32 %v1098_v20, %v1040_v44 }
 0x21f   : > { %v1211_v24 = vpop.f32.mrf.mxu2 }
 0x220   : > { %v1212_v33 = vadd.f32 %v1211_v24, %v1153_v55  ;;  %v1260_v53 = vmax.f32 %v1099_v48, 0.0 }
 0x221   : > { %v1154_v26 = vpop.f32.mrf.mxu1 }
 0x222   : > { %v1155_v34 = vadd.f32 %v1154_v26, %v2829_v41  ;;  %v1257_v39 = vmax.f32 %v1212_v33, 0.0 }
 0x223   : > { %v1041_v30 = vpop.f32.mrf.mxu3  ;;  %v1100_v31 = vpop.f32.mrf.mxu0 }
 0x224   : > { %v1042_v40 = vadd.f32 %v1041_v30, %v2824_v28 }
 0x226   : > { %v1101_v46 = vadd.f32 %v1100_v31, %v1042_v40 }
 0x227   : > { %v1213_v36 = vpop.f32.mrf.mxu2 }
 0x228   : > { %v1214_v37 = vadd.f32 %v1213_v36, %v1155_v34  ;;  %1461 = vmatmul.bf16.gmra.mxu3 %v1286_v35  ;;  %v1262_v50 = vmax.f32 %v1101_v46, 0.0  ;;  %v2869_v46 = vld [vmem:[%s2951_s8] ss:$0 sm:$0xff] }
 0x229   : > { %v1157_v38 = vpop.f32.mrf.mxu1 }
 0x22a   : > { %v1259_v63 = vmax.f32 %v1214_v37, 0.0  ;;  %v1158_v54 = vadd.f32 %v1157_v38, %v2829_v41  ;;  %v1288_v58 = vpack.c.bf16 %v1262_v50, %v1260_v53 }
 0x22b   : > { %v1044_v42 = vpop.f32.mrf.mxu3  ;;  %v1103_v43 = vpop.f32.mrf.mxu0 }
 0x22c   : > { %v1287_v45 = vpack.c.bf16 %v1259_v63, %v1257_v39  ;;  %v1045_v4 = vadd.f32 %v1044_v42, %v2824_v28 }
 0x22e   : > { %1520 = vmatmul.bf16.gmra.mxu0 %v1287_v45  ;;  %v1104_v8 = vadd.f32 %v1103_v43, %v1045_v4 }
 0x22f   : > { %v1216_v47 = vpop.f32.mrf.mxu2 }
 0x230   : > { %v1217_v56 = vadd.f32 %v1216_v47, %v1158_v54  ;;  %v1264_v12 = vmax.f32 %v1104_v8, 0.0 }
 0x231   : > { %v1159_v49 = vpop.f32.mrf.mxu1 }
 0x232   : > { %v1160_v57 = vadd.f32 %v1159_v49, %v2829_v41  ;;  %v1261_v62 = vmax.f32 %v1217_v56, 0.0 }
 0x233   : > { %v1046_v51 = vpop.f32.mrf.mxu3  ;;  %v1105_v52 = vpop.f32.mrf.mxu0 }
 0x234   : > { %v1047_v0 = vadd.f32 %v1046_v51, %v2824_v28 }
 0x236   : > { %v1106_v6 = vadd.f32 %v1105_v52, %v1047_v0 }
 0x237   : > { %v1218_v59 = vpop.f32.mrf.mxu2 }
 0x238   : > { %v1219_v60 = vadd.f32 %v1218_v59, %v1160_v57  ;;  %1466 = vmatmul.bf16.gmra.mxu3 %v1288_v58  ;;  %v1266_v10 = vmax.f32 %v1106_v6, 0.0 }
 0x239   : > { %v1162_v61 = vpop.f32.mrf.mxu1 }
 0x23a   : > { %v1263_v1 = vmax.f32 %v1219_v60, 0.0  ;;  %v1163_v13 = vadd.f32 %v1162_v61, %v2829_v41  ;;  %v1290_v16 = vpack.c.bf16 %v1266_v10, %v1264_v12 }
 0x23b   : > { %v1049_v2 = vpop.f32.mrf.mxu3  ;;  %v1108_v3 = vpop.f32.mrf.mxu0 }
 0x23c   : > { %v1289_v5 = vpack.c.bf16 %v1263_v1, %v1261_v62  ;;  %v1050_v25 = vadd.f32 %v1049_v2, %v2824_v28 }
 0x23e   : > { %1525 = vmatmul.bf16.gmra.mxu0 %v1289_v5  ;;  %v1109_v31 = vadd.f32 %v1108_v3, %v1050_v25 }
 0x23f   : > { %v1221_v7 = vpop.f32.mrf.mxu2 }
 0x240   : > { %v1222_v14 = vadd.f32 %v1221_v7, %v1163_v13  ;;  %v1268_v35 = vmax.f32 %v1109_v31, 0.0 }
 0x241   : > { %v1164_v9 = vpop.f32.mrf.mxu1 }
 0x242   : > { %v1165_v15 = vadd.f32 %v1164_v9, %v2829_v41  ;;  %v1265_v20 = vmax.f32 %v1222_v14, 0.0 }
 0x243   : > { %v1051_v11 = vpop.f32.mrf.mxu3  ;;  %v1110_v29 = vpop.f32.mrf.mxu0 }
 0x244   : > { %v1052_v21 = vadd.f32 %v1051_v11, %v2824_v28 }
 0x246   : > { %v1111_v27 = vadd.f32 %v1110_v29, %v1052_v21 }
 0x247   : > { %v1223_v17 = vpop.f32.mrf.mxu2 }
 0x248   : > { %v1224_v18 = vadd.f32 %v1223_v17, %v1165_v15  ;;  %1471 = vmatmul.bf16.gmra.mxu3 %v1290_v16  ;;  %v1270_v55 = vmax.f32 %v1111_v27, 0.0 }
 0x249   : > { %v1167_v19 = vpop.f32.mrf.mxu1 }
 0x24a   : > { %v1267_v22 = vmax.f32 %v1224_v18, 0.0  ;;  %v1168_v36 = vadd.f32 %v1167_v19, %v2829_v41  ;;  %v1292_v37 = vpack.c.bf16 %v1270_v55, %v1268_v35 }
 0x24b   : > { %v1054_v23 = vpop.f32.mrf.mxu3  ;;  %v1113_v24 = vpop.f32.mrf.mxu0 }
 0x24c   : > { %v1291_v26 = vpack.c.bf16 %v1267_v22, %v1265_v20  ;;  %v1055_v49 = vadd.f32 %v1054_v23, %v2824_v28 }
 0x24e   : > { %1530 = vmatmul.bf16.gmra.mxu0 %v1291_v26  ;;  %v1114_v54 = vadd.f32 %v1113_v24, %v1055_v49 }
 0x24f   : > { %v1226_v30 = vpop.f32.mrf.mxu2 }
 0x250   : > { %v1227_v38 = vadd.f32 %v1226_v30, %v1168_v36  ;;  %v1272_v61 = vmax.f32 %v1114_v54, 0.0 }
 0x251   : > { %v1169_v32 = vpop.f32.mrf.mxu1 }
 0x252   : > { %v1170_v39 = vadd.f32 %v1169_v32, %v2829_v41  ;;  %v1269_v43 = vmax.f32 %v1227_v38, 0.0 }
 0x253   : > { %v1056_v33 = vpop.f32.mrf.mxu3  ;;  %v1115_v34 = vpop.f32.mrf.mxu0 }
 0x254   : > { %v1057_v44 = vadd.f32 %v1056_v33, %v2824_v28 }
 0x256   : > { %v1116_v51 = vadd.f32 %v1115_v34, %v1057_v44 }
 0x257   : > { %v1228_v40 = vpop.f32.mrf.mxu2 }
 0x258   : > { %v1229_v63 = vadd.f32 %v1228_v40, %v1170_v39  ;;  %1476 = vmatmul.bf16.gmra.mxu3 %v1292_v37  ;;  %v1274_v56 = vmax.f32 %v1116_v51, 0.0 }
 0x259   : > { %v1172_v42 = vpop.f32.mrf.mxu1 }
 0x25a   : > { %v1271_v45 = vmax.f32 %v1229_v63, 0.0  ;;  %v1173_v62 = vadd.f32 %v1172_v42, %v2829_v41  ;;  %v1294_v28 = vpack.c.bf16 %v1274_v56, %v1272_v61 }
 0x25b   : > { %v1437_v47 = vpop.f32.mrf.mxu3  ;;  %v1496_v48 = vpop.f32.mrf.mxu0 }
 0x25c   : > { %v1293_v50 = vpack.c.bf16 %v1271_v45, %v1269_v43  ;;  %v1438_v52 = vadd.f32 %v2869_v46, %v1437_v47 }
 0x25e   : > { %1535 = vmatmul.bf16.gmra.mxu0 %v1293_v50  ;;  %v1497_v58 = vadd.f32 %v1496_v48, %v1438_v52 }
 0x25f   : > { %v1231_v53 = vpop.f32.mrf.mxu2 }
 0x260   : > { %v1232_v1 = vadd.f32 %v1231_v53, %v1173_v62  ;;  %2169 = vtanh.f32 %v1497_v58 }
 0x261   : > { %v1174_v57 = vpop.f32.mrf.mxu1 }
 0x262   : > { %v1175_v2 = vadd.f32 %v1174_v57, %v2829_v41  ;;  %v1273_v6 = vmax.f32 %v1232_v1, 0.0 }
 0x263   : > { %v1439_v59 = vpop.f32.mrf.mxu3  ;;  %v1498_v60 = vpop.f32.mrf.mxu0 }
 0x264   : > { %v1440_v0 = vadd.f32 %v2869_v46, %v1439_v59 }
 0x266   : > { %v1499_v3 = vadd.f32 %v1498_v60, %v1440_v0  ;;  %v2170_v11 = vpop.eup %2169 }
 0x267   : > { %v1233_v4 = vpop.f32.mrf.mxu2 }
 0x268   : > { %2171 = vtanh.f32 %v1499_v3  ;;  %v1234_v5 = vadd.f32 %v1233_v4, %v1175_v2  ;;  %1481 = vmatmul.bf16.gmra.mxu3 %v1294_v28 }
 0x26a   : > { %v1275_v7 = vmax.f32 %v1234_v5, 0.0 }
 0x26b   : > { %v1442_v8 = vpop.f32.mrf.mxu3  ;;  %v1501_v9 = vpop.f32.mrf.mxu0 }
 0x26c   : > { %v1295_v10 = vpack.c.bf16 %v1275_v7, %v1273_v6  ;;  %v1443_v41 = vadd.f32 %v2869_v46, %v1442_v8 }
 0x26e   : > { %v2172_v29 = vpop.eup %2171  ;;  %1540 = vmatmul.bf16.gmra.mxu0 %v1295_v10  ;;  %v1502_v13 = vadd.f32 %v1501_v9, %v1443_v41 }
 0x26f   : > { %v2050_v12 = vpack.c.bf16 %v2172_v29, %v2170_v11 }
 0x270   : > { %2173 = vtanh.f32 %v1502_v13 }
 0x271   : > { %2051 = vst [vmem:[%s2880_s27] sm:$0xff] %v2050_v12  }
 0x273   : > { %v1444_v14 = vpop.f32.mrf.mxu3  ;;  %v1503_v15 = vpop.f32.mrf.mxu0 }
 0x274   : > { %v1445_v16 = vadd.f32 %v2869_v46, %v1444_v14 }
 0x276   : > { %v1504_v17 = vadd.f32 %v1503_v15, %v1445_v16  ;;  %v2174_v20 = vpop.eup %2173 }
 0x278   : > { %2175 = vtanh.f32 %v1504_v17 }
 0x27b   : > { %v1447_v18 = vpop.f32.mrf.mxu3  ;;  %v1506_v19 = vpop.f32.mrf.mxu0 }
 0x27c   : > { %v1448_v23 = vadd.f32 %v2869_v46, %v1447_v18 }
 0x27e   : > { %v2176_v21 = vpop.eup %2175  ;;  %v1507_v24 = vadd.f32 %v1506_v19, %v1448_v23 }
 0x27f   : > { %v2055_v22 = vpack.c.bf16 %v2176_v21, %v2174_v20 }
 0x280   : > { %2177 = vtanh.f32 %v1507_v24 }
 0x281   : > { %2097 = vst [vmem:[%s2880_s27 + $0x8] sm:$0xff] %v2055_v22  }
 0x283   : > { %v1449_v25 = vpop.f32.mrf.mxu3  ;;  %v1508_v26 = vpop.f32.mrf.mxu0 }
 0x284   : > { %v1450_v27 = vadd.f32 %v2869_v46, %v1449_v25 }
 0x286   : > { %v1509_v30 = vadd.f32 %v1508_v26, %v1450_v27  ;;  %v2178_v55 = vpop.eup %2177 }
 0x288   : > { %2179 = vtanh.f32 %v1509_v30 }
 0x28b   : > { %v1452_v31 = vpop.f32.mrf.mxu3  ;;  %v1511_v32 = vpop.f32.mrf.mxu0 }
 0x28c   : > { %v1453_v35 = vadd.f32 %v2869_v46, %v1452_v31 }
 0x28e   : > { %v2180_v33 = vpop.eup %2179  ;;  %v1512_v36 = vadd.f32 %v1511_v32, %v1453_v35 }
 0x28f   : > { %v2060_v34 = vpack.c.bf16 %v2180_v33, %v2178_v55 }
 0x290   : > { %2181 = vtanh.f32 %v1512_v36 }
 0x291   : > { %2098 = vst [vmem:[%s2880_s27 + $0x10] sm:$0xff] %v2060_v34  }
 0x293   : > { %v1454_v37 = vpop.f32.mrf.mxu3  ;;  %v1513_v38 = vpop.f32.mrf.mxu0 }
 0x294   : > { %v1455_v39 = vadd.f32 %v2869_v46, %v1454_v37 }
 0x296   : > { %v1514_v40 = vadd.f32 %v1513_v38, %v1455_v39  ;;  %v2182_v43 = vpop.eup %2181 }
 0x298   : > { %2183 = vtanh.f32 %v1514_v40 }
 0x29b   : > { %v1457_v63 = vpop.f32.mrf.mxu3  ;;  %v1516_v42 = vpop.f32.mrf.mxu0 }
 0x29c   : > { %v1458_v47 = vadd.f32 %v2869_v46, %v1457_v63 }
 0x29e   : > { %v2184_v44 = vpop.eup %2183  ;;  %v1517_v48 = vadd.f32 %v1516_v42, %v1458_v47 }
 0x29f   : > { %v2065_v45 = vpack.c.bf16 %v2184_v44, %v2182_v43 }
 0x2a0   : > { %2185 = vtanh.f32 %v1517_v48 }
 0x2a1   : > { %2099 = vst [vmem:[%s2880_s27 + $0x18] sm:$0xff] %v2065_v45  }
 0x2a3   : > { %v1459_v49 = vpop.f32.mrf.mxu3  ;;  %v1518_v50 = vpop.f32.mrf.mxu0 }
 0x2a4   : > { %v1460_v51 = vadd.f32 %v2869_v46, %v1459_v49 }
 0x2a6   : > { %v1519_v52 = vadd.f32 %v1518_v50, %v1460_v51  ;;  %v2186_v56 = vpop.eup %2185 }
 0x2a8   : > { %2187 = vtanh.f32 %v1519_v52 }
 0x2ab   : > { %v1462_v53 = vpop.f32.mrf.mxu3  ;;  %v1521_v54 = vpop.f32.mrf.mxu0 }
 0x2ac   : > { %v1463_v59 = vadd.f32 %v2869_v46, %v1462_v53 }
 0x2ae   : > { %v2188_v57 = vpop.eup %2187  ;;  %v1522_v60 = vadd.f32 %v1521_v54, %v1463_v59 }
 0x2af   : > { %v2070_v58 = vpack.c.bf16 %v2188_v57, %v2186_v56 }
 0x2b0   : > { %2189 = vtanh.f32 %v1522_v60 }
 0x2b1   : > { %2100 = vst [vmem:[%s2880_s27 + $0x20] sm:$0xff] %v2070_v58  }
 0x2b3   : > { %v1464_v61 = vpop.f32.mrf.mxu3  ;;  %v1523_v62 = vpop.f32.mrf.mxu0 }
 0x2b4   : > { %v1465_v0 = vadd.f32 %v2869_v46, %v1464_v61 }
 0x2b6   : > { %v1524_v28 = vadd.f32 %v1523_v62, %v1465_v0  ;;  %v2190_v3 = vpop.eup %2189 }
 0x2b8   : > { %2191 = vtanh.f32 %v1524_v28 }
 0x2bb   : > { %v1467_v1 = vpop.f32.mrf.mxu3  ;;  %v1526_v2 = vpop.f32.mrf.mxu0 }
 0x2bc   : > { %v1468_v6 = vadd.f32 %v2869_v46, %v1467_v1 }
 0x2be   : > { %v2192_v4 = vpop.eup %2191  ;;  %v1527_v7 = vadd.f32 %v1526_v2, %v1468_v6 }
 0x2bf   : > { %v2075_v5 = vpack.c.bf16 %v2192_v4, %v2190_v3 }
 0x2c0   : > { %2193 = vtanh.f32 %v1527_v7 }
 0x2c1   : > { %2101 = vst [vmem:[%s2880_s27 + $0x28] sm:$0xff] %v2075_v5  }
 0x2c3   : > { %v1469_v8 = vpop.f32.mrf.mxu3  ;;  %v1528_v9 = vpop.f32.mrf.mxu0 }
 0x2c4   : > { %v1470_v10 = vadd.f32 %v2869_v46, %v1469_v8 }
 0x2c6   : > { %v1529_v11 = vadd.f32 %v1528_v9, %v1470_v10  ;;  %v2194_v41 = vpop.eup %2193 }
 0x2c8   : > { %2195 = vtanh.f32 %v1529_v11 }
 0x2cb   : > { %v1472_v29 = vpop.f32.mrf.mxu3  ;;  %v1531_v12 = vpop.f32.mrf.mxu0 }
 0x2cc   : > { %v1473_v15 = vadd.f32 %v2869_v46, %v1472_v29 }
 0x2ce   : > { %v2196_v13 = vpop.eup %2195  ;;  %v1532_v16 = vadd.f32 %v1531_v12, %v1473_v15 }
 0x2cf   : > { %v2080_v14 = vpack.c.bf16 %v2196_v13, %v2194_v41 }
 0x2d0   : > { %2197 = vtanh.f32 %v1532_v16 }
 0x2d1   : > { %2102 = vst [vmem:[%s2880_s27 + $0x30] sm:$0xff] %v2080_v14  }
 0x2d3   : > { %v1474_v17 = vpop.f32.mrf.mxu3  ;;  %v1533_v18 = vpop.f32.mrf.mxu0 }
 0x2d4   : > { %v1475_v19 = vadd.f32 %v2869_v46, %v1474_v17 }
 0x2d6   : > { %v1534_v20 = vadd.f32 %v1533_v18, %v1475_v19  ;;  %v2198_v23 = vpop.eup %2197 }
 0x2d8   : > { %2199 = vtanh.f32 %v1534_v20 }
 0x2db   : > { %v1477_v21 = vpop.f32.mrf.mxu3  ;;  %v1536_v22 = vpop.f32.mrf.mxu0 }
 0x2dc   : > { %v1478_v26 = vadd.f32 %v2869_v46, %v1477_v21 }
 0x2de   : > { %v2200_v24 = vpop.eup %2199  ;;  %v1537_v27 = vadd.f32 %v1536_v22, %v1478_v26 }
 0x2df   : > { %v2085_v25 = vpack.c.bf16 %v2200_v24, %v2198_v23 }
 0x2e0   : > { %2201 = vtanh.f32 %v1537_v27 }
 0x2e1   : > { %2103 = vst [vmem:[%s2880_s27 + $0x38] sm:$0xff] %v2085_v25  }
 0x2e3   : > { %v1479_v30 = vpop.f32.mrf.mxu3  ;;  %v1538_v31 = vpop.f32.mrf.mxu0 }
 0x2e4   : > { %v1480_v32 = vadd.f32 %v2869_v46, %v1479_v30 }
 0x2e6   : > { %v1539_v55 = vadd.f32 %v1538_v31, %v1480_v32  ;;  %v2202_v35 = vpop.eup %2201 }
 0x2e8   : > { %2203 = vtanh.f32 %v1539_v55 }
 0x2eb   : > { %v1482_v33 = vpop.f32.mrf.mxu3  ;;  %v1541_v34 = vpop.f32.mrf.mxu0 }
 0x2ec   : > { %v1483_v38 = vadd.f32 %v2869_v46, %v1482_v33 }
 0x2ee   : > { %v2204_v36 = vpop.eup %2203  ;;  %v1542_v39 = vadd.f32 %v1541_v34, %v1483_v38 }
 0x2ef   : > { %v2090_v37 = vpack.c.bf16 %v2204_v36, %v2202_v35 }
 0x2f0   : > { %2205 = vtanh.f32 %v1542_v39 }
 0x2f1   : > { %2104 = vst [vmem:[%s2880_s27 + $0x40] sm:$0xff] %v2090_v37  }
 0x2f3   : > { %v1484_v40 = vpop.f32.mrf.mxu3  ;;  %v1543_v42 = vpop.f32.mrf.mxu0 }
 0x2f4   : > { %v1485_v63 = vadd.f32 %v2869_v46, %v1484_v40 }
 0x2f6   : > { %v1544_v43 = vadd.f32 %v1543_v42, %v1485_v63  ;;  %v2206_v44 = vpop.eup %2205 }
 0x2f8   : > { %2207 = vtanh.f32 %v1544_v43 }
 0x2fe   : > { %v2208_v45 = vpop.eup %2207 }
 0x2ff   : > { %v2095_v47 = vpack.c.bf16 %v2208_v45, %v2206_v44 }
 0x301   : > { %2105 = vst [vmem:[%s2880_s27 + $0x48] sm:$0xff] %v2095_v47  }
 0x302   : > { %2266 = shalt.err (!%p2263_p8)
}
 0x303   : > { %s2310_s22 = smov 64   ;;  %s2311_s27 = smov 4  }
 0x304   : > { %2117 = dma.vmem_to_hbm [thread:$0]  (%p2400_p5), %s1620_s17, 1280, %s1622_s21, %s1607_s23, %s2310_s22, %s2310_s22, %s2311_s27  }
 0x305 PF: > { %p2129_p9 = scmp.ge.s32.totalorder %s2305_s12, 2  ;;  %s1636_s16 = sand.u32 1, %s2293_s30  }
 0x306   : > { %s1637_s25 = scalar_lea.sflag [#allocation4], %s1636_s16 }
 0x307   : > { %p2124_p10 = pnand %p2129_p9, %p2404_p6 }
 0x309   : > { %p2125_p11 = pneg %p2124_p10 }
 0x30b   : > { %2288 = dma.done.wait (%p2125_p11), %s1637_s25, 1280  }
 0x30c   : > { %2290 = vsyncadd (%p2125_p11), %s1637_s25, 4294966016  ;;  %p20_p12 = scmp.ge.s32.totalorder %s2387_s15, 4   ;;  %s2955_s30 = smov %s2297_s10 }
 0x30d   : > { %s2956_s10 = smov %s2301_s11  ;;  %s2957_s11 = smov %s2398_s18 }
 0x30e   : > { %s2958_s12 = smov %s2387_s15  ;;  %22 = sbr.rel (!%p20_p12) target bundleno = 4 (0x4), region = 96 }
 0x313   :  { %1643 = vsyncpa [#allocation3], 1 }
 0x314   :  { %1645 = vsyncpa [#allocation3 + $0x1], 1 }
 0x315   :  { %1646 = vsyncpa [#allocation4], 1 }
 0x316   :  { %1648 = vsyncpa [#allocation4 + $0x1], 1 }

</bundles_post_ra>
